<compile_context>
chip_gen: v5e
topology: v5e:2x2
jax: 0.10.0
libtpu: 0.0.40
codegen_flags: <defaults>
</compile_context>

<pallas_src>
import functools
import math

import jax
import jax.numpy as jnp
import numpy as np
from jax.experimental import pallas as pl
from jax.experimental.pallas import tpu as pltpu

_EPS = 1e-5
_VMEM_LIMIT = 48 * 1024 * 1024  # re-derived for v7x's 64 MiB VMEM/TC


def _round_up(x, m):
    return ((x + m - 1) // m) * m


def _pick_tk(k_pad):
    # largest multiple-of-128 divisor of k_pad that is <= 512
    for cand in (512, 384, 256, 128):
        if cand <= k_pad and k_pad % cand == 0:
            return cand
    return k_pad


def extract_patches(x, ksize, stride):
    """x: (B, H, W, C) NHWC -> ((B*Ho*Wo, ksize*ksize*C), (B, Ho, Wo)).

    Patch column ordering is (kh, kw, c), matching an HWIO weight reshape.
    """
    B, H, W, C = x.shape
    Ho = (H - ksize) // stride + 1
    Wo = (W - ksize) // stride + 1
    cols = []
    for kh in range(ksize):
        for kw in range(ksize):
            sl = x[:, kh:kh + stride * (Ho - 1) + 1:stride,
                   kw:kw + stride * (Wo - 1) + 1:stride, :]
            cols.append(sl)
    p = jnp.concatenate(cols, axis=-1)                 # (B, Ho, Wo, k*k*C)
    return p.reshape(B * Ho * Wo, ksize * ksize * C), (B, Ho, Wo)


# ----------------------------------------------------------------------------
# Fused conv (matmul) + BatchNorm (batch stats) + ReLU kernel
# ----------------------------------------------------------------------------
def _conv_bn_relu_kernel(p_ref, w_ref, g_ref, b_ref, o_ref, acc_ref, *,
                         m_valid, eps):
    k = pl.program_id(0)

    @pl.when(k == 0)
    def _():
        acc_ref[...] = jnp.zeros_like(acc_ref)

    # bf16 x bf16 -> f32 accumulation on the MXU.
    acc_ref[...] += jnp.dot(p_ref[...], w_ref[...],
                            preferred_element_type=jnp.float32)

    @pl.when(k == pl.num_programs(0) - 1)
    def _():
        acc = acc_ref[...]                              # (M_pad, 128) f32
        rows = jax.lax.broadcasted_iota(jnp.int32, acc.shape, 0)
        mask = (rows < m_valid).astype(jnp.float32)     # exclude padded M rows
        inv_n = jnp.float32(1.0 / m_valid)
        mean = jnp.sum(acc * mask, axis=0, keepdims=True) * inv_n   # (1, 128)
        cent = (acc - mean) * mask
        var = jnp.sum(cent * cent, axis=0, keepdims=True) * inv_n   # biased
        inv_std = jax.lax.rsqrt(var + eps)              # EUP, once per channel
        scale = g_ref[...] * inv_std                    # (1, 128)
        shift = b_ref[...] - mean * scale
        o_ref[...] = jnp.maximum(acc * scale + shift, 0.0).astype(o_ref.dtype)


def conv_bn_relu(x, w_hwio, gamma, beta, *, stride=2, eps=_EPS):
    """x: (B, H, W, Cin) f32; w_hwio: (KH, KW, Cin, Cout); returns (B, Ho, Wo, Cout) f32."""
    KH, KW, Cin, Cout = w_hwio.shape
    patches, (B, Ho, Wo) = extract_patches(x, KH, stride)
    M, K = patches.shape
    M_pad = _round_up(M, 8)
    K_pad = _round_up(K, 128)
    CP = _round_up(Cout, 128)                           # lane-dense output
    tk = _pick_tk(K_pad)

    p = jnp.zeros((M_pad, K_pad), jnp.bfloat16).at[:M, :K].set(
        patches.astype(jnp.bfloat16))
    wm = w_hwio.reshape(K, Cout)
    wp = jnp.zeros((K_pad, CP), jnp.bfloat16).at[:K, :Cout].set(
        wm.astype(jnp.bfloat16))
    gp = jnp.ones((1, CP), jnp.float32).at[0, :Cout].set(gamma)
    bp = jnp.zeros((1, CP), jnp.float32).at[0, :Cout].set(beta)

    out = pl.pallas_call(
        functools.partial(_conv_bn_relu_kernel, m_valid=M, eps=eps),
        out_shape=jax.ShapeDtypeStruct((M_pad, CP), jnp.bfloat16),
        grid_spec=pltpu.PrefetchScalarGridSpec(
            num_scalar_prefetch=0,
            grid=(K_pad // tk,),
            in_specs=[
                pl.BlockSpec((M_pad, tk), lambda k: (0, k)),
                pl.BlockSpec((tk, CP), lambda k: (k, 0)),
                pl.BlockSpec((1, CP), lambda k: (0, 0)),
                pl.BlockSpec((1, CP), lambda k: (0, 0)),
            ],
            out_specs=pl.BlockSpec((M_pad, CP), lambda k: (0, 0)),
            scratch_shapes=[pltpu.VMEM((M_pad, CP), jnp.float32)],
        ),
        compiler_params=pltpu.CompilerParams(
            dimension_semantics=("arbitrary",),
            vmem_limit_bytes=_VMEM_LIMIT,
        ),
    )(p, wp, gp, bp)

    return out[:M, :Cout].astype(jnp.float32).reshape(B, Ho, Wo, Cout)


# ----------------------------------------------------------------------------
# Linear head kernel (weights fully resident in VMEM)
# ----------------------------------------------------------------------------
def _linear_kernel(x_ref, w_ref, b_ref, o_ref):
    o_ref[...] = (jnp.dot(x_ref[...], w_ref[...],
                          preferred_element_type=jnp.float32)
                  + b_ref[...]).astype(o_ref.dtype)


def linear_head(feats, w, b):
    """feats: (B, F) f32; w: (F, A); b: (A,) -> (B, A) f32."""
    Bn, F = feats.shape
    A = w.shape[1]
    Bp = _round_up(max(Bn, 8), 8)
    Fp = _round_up(F, 128)
    Ap = _round_up(A, 128)                              # lane-dense output

    xp = jnp.zeros((Bp, Fp), jnp.bfloat16).at[:Bn, :F].set(
        feats.astype(jnp.bfloat16))
    wp = jnp.zeros((Fp, Ap), jnp.bfloat16).at[:F, :A].set(
        w.astype(jnp.bfloat16))
    bp = jnp.zeros((1, Ap), jnp.float32).at[0, :A].set(b)

    out = pl.pallas_call(
        _linear_kernel,
        out_shape=jax.ShapeDtypeStruct((Bp, Ap), jnp.float32),
        compiler_params=pltpu.CompilerParams(vmem_limit_bytes=_VMEM_LIMIT),
    )(xp, wp, bp)
    return out[:Bn, :A]


# ----------------------------------------------------------------------------
# Full forward pass (matches DQN.forward semantics; NCHW input)
# ----------------------------------------------------------------------------
def dqn_forward(x_nchw, params):
    x = jnp.transpose(x_nchw, (0, 2, 3, 1)).astype(jnp.float32)   # NHWC
    for name in ("conv1", "conv2", "conv3"):
        w, g, b = params[name]
        x = conv_bn_relu(x, w, g, b)
    # PyTorch's x.view(B, -1) flattens in (C, H, W) order -> transpose back.
    B = x.shape[0]
    feats = jnp.transpose(x, (0, 3, 1, 2)).reshape(B, -1)
    wh, bh = params["head"]
    return linear_head(feats, wh, bh)


# ----------------------------------------------------------------------------
# Pure-JAX reference (same bf16 rounding points, f32 math)
# ----------------------------------------------------------------------------
def _bf16_round(a):
    return a.astype(jnp.bfloat16).astype(jnp.float32)


def ref_forward(x_nchw, params):
    x = jnp.transpose(x_nchw, (0, 2, 3, 1)).astype(jnp.float32)
    for name in ("conv1", "conv2", "conv3"):
        w, g, b = params[name]
        p, (B, Ho, Wo) = extract_patches(x, w.shape[0], 2)
        y = jnp.dot(_bf16_round(p), _bf16_round(w.reshape(-1, w.shape[-1])),
                    precision="highest")
        mean = jnp.mean(y, axis=0, keepdims=True)
        var = jnp.mean((y - mean) ** 2, axis=0, keepdims=True)
        y = jnp.maximum((y - mean) * jax.lax.rsqrt(var + _EPS) * g + b, 0.0)
        x = _bf16_round(y).reshape(B, Ho, Wo, -1)
    B = x.shape[0]
    feats = jnp.transpose(x, (0, 3, 1, 2)).reshape(B, -1)
    wh, bh = params["head"]
    return jnp.dot(_bf16_round(feats), _bf16_round(wh),
                   precision="highest") + bh


if __name__ == "__main__":
    def conv_size_out(s, k=5, stride=2):
        return (s - (k - 1) - 1) // stride + 1

    B, Cin, H, W = 2, 3, 40, 40
    num_actions = 4
    ch, cw = H, W
    for _ in range(3):
        ch, cw = conv_size_out(ch), conv_size_out(cw)
    F = ch * cw * 32                                    # 2*2*32 = 128

    key = jax.random.PRNGKey(0)
    ks = jax.random.split(key, 12)

    def conv_w(k, kh, kw, ci, co):
        return jax.random.normal(k, (kh, kw, ci, co), jnp.float32) / math.sqrt(kh * kw * ci)

    params = {
        "conv1": (conv_w(ks[0], 5, 5, 3, 16),
                  1.0 + 0.1 * jax.random.normal(ks[1], (16,), jnp.float32),
                  0.1 * jax.random.normal(ks[2], (16,), jnp.float32)),
        "conv2": (conv_w(ks[3], 5, 5, 16, 32),
                  1.0 + 0.1 * jax.random.normal(ks[4], (32,), jnp.float32),
                  0.1 * jax.random.normal(ks[5], (32,), jnp.float32)),
        "conv3": (conv_w(ks[6], 5, 5, 32, 32),
                  1.0 + 0.1 * jax.random.normal(ks[7], (32,), jnp.float32),
                  0.1 * jax.random.normal(ks[8], (32,), jnp.float32)),
        "head": (jax.random.normal(ks[9], (F, num_actions), jnp.float32) / math.sqrt(F),
                 0.01 * jax.random.normal(ks[10], (num_actions,), jnp.float32)),
    }

    x = jax.random.uniform(ks[11], (B, Cin, H, W), jnp.float32)

    fwd = jax.jit(dqn_forward)
    out = jax.block_until_ready(fwd(x, params))
    assert out.shape == (B, num_actions)

    ref = jax.block_until_ready(ref_forward(x, params))
    np.testing.assert_allclose(np.asarray(out), np.asarray(ref),
                               rtol=1e-2, atol=1e-2)

    print("KERNEL_OK")
</pallas_src>

<mosaic_0001>
module attributes {stable_mosaic.version = 11 : i64} {
  func.func @_conv_bn_relu_kernel(%arg0: i32, %arg1: memref<648x128xbf16, #tpu.memory_space<vmem>>, %arg2: memref<128x128xbf16, #tpu.memory_space<vmem>>, %arg3: memref<1x128xf32, #tpu.memory_space<vmem>>, %arg4: memref<1x128xf32, #tpu.memory_space<vmem>>, %arg5: memref<648x128xbf16, #tpu.memory_space<vmem>>, %arg6: memref<648x128xf32, #tpu.memory_space<vmem>>) attributes {dimension_semantics = [#tpu.dimension_semantics<arbitrary>], iteration_bounds = array<i64: 1>, scalar_prefetch = 0 : i64, scratch_operands = 1 : i64, tpu.core_type = #tpu.core_type<tc>, window_params = [{transform_indices = @transform_0, window_bounds = array<i64: 648, 128>}, {transform_indices = @transform_1, window_bounds = array<i64: 128, 128>}, {pipeline_mode = #tpu.pipeline_mode<synchronous>, transform_indices = @transform_2, window_bounds = array<i64: 1, 128>}, {pipeline_mode = #tpu.pipeline_mode<synchronous>, transform_indices = @transform_3, window_bounds = array<i64: 1, 128>}, {pipeline_mode = #tpu.pipeline_mode<synchronous>, transform_indices = @transform_4, window_bounds = array<i64: 648, 128>}]} {
    %c0_i32 = arith.constant 0 : i32
    %0 = arith.cmpi eq, %arg0, %c0_i32 : i32
    %1 = arith.extui %0 : i1 to i32
    %c0_i32_0 = arith.constant 0 : i32
    %2 = arith.cmpi ne, %1, %c0_i32_0 : i32
    scf.if %2 {
      %cst_10 = arith.constant 0.000000e+00 : f32
      %12 = vector.broadcast %cst_10 : f32 to vector<648x128xf32>
      %c0_11 = arith.constant 0 : index
      %c0_12 = arith.constant 0 : index
      %13 = vector.load %arg6[%c0_11, %c0_12] : memref<648x128xf32, #tpu.memory_space<vmem>>, vector<648x128xf32>
      tpu.vector_store %arg6[%c0_11, %c0_12], %12 {strides = array<i32>} : memref<648x128xf32, #tpu.memory_space<vmem>>, vector<648x128xf32>,
    } else {
    }
    %c0 = arith.constant 0 : index
    %c0_1 = arith.constant 0 : index
    %3 = vector.load %arg6[%c0, %c0_1] : memref<648x128xf32, #tpu.memory_space<vmem>>, vector<648x128xf32>
    %c0_2 = arith.constant 0 : index
    %c0_3 = arith.constant 0 : index
    %4 = vector.load %arg1[%c0_2, %c0_3] : memref<648x128xbf16, #tpu.memory_space<vmem>>, vector<648x128xbf16>
    %c0_4 = arith.constant 0 : index
    %c0_5 = arith.constant 0 : index
    %5 = vector.load %arg2[%c0_4, %c0_5] : memref<128x128xbf16, #tpu.memory_space<vmem>>, vector<128x128xbf16>
    %cst = arith.constant dense<0.000000e+00> : vector<648x128xf32>
    %6 = tpu.matmul %4, %5, %cst {dimension_numbers = #tpu.dot_dimension_numbers<[1], [0], [0], [1], [0, 0, 1, 1], [], []>} : vector<648x128xbf16>, vector<128x128xbf16>, vector<648x128xf32> -> vector<648x128xf32>
    %7 = arith.addf %3, %6 : vector<648x128xf32>
    %c0_6 = arith.constant 0 : index
    %c0_7 = arith.constant 0 : index
    %8 = vector.load %arg6[%c0_6, %c0_7] : memref<648x128xf32, #tpu.memory_space<vmem>>, vector<648x128xf32>
    tpu.vector_store %arg6[%c0_6, %c0_7], %7 {strides = array<i32>} : memref<648x128xf32, #tpu.memory_space<vmem>>, vector<648x128xf32>,
    %c0_i32_8 = arith.constant 0 : i32
    %9 = arith.cmpi eq, %arg0, %c0_i32_8 : i32
    %10 = arith.extui %9 : i1 to i32
    %c0_i32_9 = arith.constant 0 : i32
    %11 = arith.cmpi ne, %10, %c0_i32_9 : i32
    scf.if %11 {
      %c0_10 = arith.constant 0 : index
      %c0_11 = arith.constant 0 : index
      %12 = vector.load %arg6[%c0_10, %c0_11] : memref<648x128xf32, #tpu.memory_space<vmem>>, vector<648x128xf32>
      %13 = tpu.iota {dimensions = array<i32: 0>} : vector<648x128xi32>
      %c648_i32 = arith.constant 648 : i32
      %14 = vector.broadcast %c648_i32 : i32 to vector<648x128xi32>
      %15 = arith.cmpi slt, %13, %14 : vector<648x128xi32>
      %16 = arith.extui %15 : vector<648x128xi1> to vector<648x128xi32>
      %17 = arith.sitofp %16 : vector<648x128xi32> to vector<648x128xf32>
      %18 = arith.mulf %12, %17 : vector<648x128xf32>
      %cst_12 = arith.constant dense<0.000000e+00> : vector<128xf32>
      %19 = vector.multi_reduction <add>, %18, %cst_12 [0] : vector<648x128xf32> to vector<128xf32>
      %20 = vector.shape_cast %19 : vector<128xf32> to vector<1x128xf32>
      %cst_13 = arith.constant 0.00154320989 : f32
      %21 = vector.broadcast %cst_13 : f32 to vector<1x128xf32>
      %22 = arith.mulf %20, %21 : vector<1x128xf32>
      %23 = vector.broadcast %22 : vector<1x128xf32> to vector<648x128xf32>
      %24 = arith.subf %12, %23 : vector<648x128xf32>
      %25 = arith.mulf %24, %17 : vector<648x128xf32>
      %26 = arith.mulf %25, %25 : vector<648x128xf32>
      %cst_14 = arith.constant dense<0.000000e+00> : vector<128xf32>
      %27 = vector.multi_reduction <add>, %26, %cst_14 [0] : vector<648x128xf32> to vector<128xf32>
      %28 = vector.shape_cast %27 : vector<128xf32> to vector<1x128xf32>
      %cst_15 = arith.constant 0.00154320989 : f32
      %29 = vector.broadcast %cst_15 : f32 to vector<1x128xf32>
      %30 = arith.mulf %28, %29 : vector<1x128xf32>
      %cst_16 = arith.constant 9.99999974E-6 : f32
      %31 = vector.broadcast %cst_16 : f32 to vector<1x128xf32>
      %32 = arith.addf %30, %31 : vector<1x128xf32>
      %33 = math.rsqrt %32 : vector<1x128xf32>
      %c0_17 = arith.constant 0 : index
      %c0_18 = arith.constant 0 : index
      %34 = vector.load %arg3[%c0_17, %c0_18] : memref<1x128xf32, #tpu.memory_space<vmem>>, vector<1x128xf32>
      %35 = arith.mulf %34, %33 : vector<1x128xf32>
      %c0_19 = arith.constant 0 : index
      %c0_20 = arith.constant 0 : index
      %36 = vector.load %arg4[%c0_19, %c0_20] : memref<1x128xf32, #tpu.memory_space<vmem>>, vector<1x128xf32>
      %37 = arith.mulf %22, %35 : vector<1x128xf32>
      %38 = arith.subf %36, %37 : vector<1x128xf32>
      %39 = vector.broadcast %35 : vector<1x128xf32> to vector<648x128xf32>
      %40 = arith.mulf %12, %39 : vector<648x128xf32>
      %41 = vector.broadcast %38 : vector<1x128xf32> to vector<648x128xf32>
      %42 = arith.addf %40, %41 : vector<648x128xf32>
      %cst_21 = arith.constant 0.000000e+00 : f32
      %43 = vector.broadcast %cst_21 : f32 to vector<648x128xf32>
      %44 = arith.maximumf %42, %43 : vector<648x128xf32>
      %45 = arith.truncf %44 : vector<648x128xf32> to vector<648x128xbf16>
      %c0_22 = arith.constant 0 : index
      %c0_23 = arith.constant 0 : index
      %46 = vector.load %arg5[%c0_22, %c0_23] : memref<648x128xbf16, #tpu.memory_space<vmem>>, vector<648x128xbf16>
      tpu.vector_store %arg5[%c0_22, %c0_23], %45 {strides = array<i32>} : memref<648x128xbf16, #tpu.memory_space<vmem>>, vector<648x128xbf16>,
    } else {
    }
    return
  }
  func.func @transform_0(%arg0: i32) -> (i32, i32) {
    %c0_i32 = arith.constant 0 : i32
    %c0_i32_0 = arith.constant 0 : i32
    return %c0_i32, %arg0 : i32, i32
  }
  func.func @transform_1(%arg0: i32) -> (i32, i32) {
    %c0_i32 = arith.constant 0 : i32
    %c0_i32_0 = arith.constant 0 : i32
    return %arg0, %c0_i32 : i32, i32
  }
  func.func @transform_2(%arg0: i32) -> (i32, i32) {
    %c0_i32 = arith.constant 0 : i32
    %c0_i32_0 = arith.constant 0 : i32
    %c0_i32_1 = arith.constant 0 : i32
    return %c0_i32, %c0_i32_0 : i32, i32
  }
  func.func @transform_3(%arg0: i32) -> (i32, i32) {
    %c0_i32 = arith.constant 0 : i32
    %c0_i32_0 = arith.constant 0 : i32
    %c0_i32_1 = arith.constant 0 : i32
    return %c0_i32, %c0_i32_0 : i32, i32
  }
  func.func @transform_4(%arg0: i32) -> (i32, i32) {
    %c0_i32 = arith.constant 0 : i32
    %c0_i32_0 = arith.constant 0 : i32
    %c0_i32_1 = arith.constant 0 : i32
    return %c0_i32, %c0_i32_0 : i32, i32
  }
}

module attributes {stable_mosaic.version = 11 : i64} {
  func.func @_conv_bn_relu_kernel(%arg0: i32, %arg1: memref<104x512xbf16, #tpu.memory_space<vmem>>, %arg2: memref<512x128xbf16, #tpu.memory_space<vmem>>, %arg3: memref<1x128xf32, #tpu.memory_space<vmem>>, %arg4: memref<1x128xf32, #tpu.memory_space<vmem>>, %arg5: memref<104x128xbf16, #tpu.memory_space<vmem>>, %arg6: memref<104x128xf32, #tpu.memory_space<vmem>>) attributes {dimension_semantics = [#tpu.dimension_semantics<arbitrary>], iteration_bounds = array<i64: 1>, scalar_prefetch = 0 : i64, scratch_operands = 1 : i64, tpu.core_type = #tpu.core_type<tc>, window_params = [{transform_indices = @transform_0, window_bounds = array<i64: 104, 512>}, {transform_indices = @transform_1, window_bounds = array<i64: 512, 128>}, {pipeline_mode = #tpu.pipeline_mode<synchronous>, transform_indices = @transform_2, window_bounds = array<i64: 1, 128>}, {pipeline_mode = #tpu.pipeline_mode<synchronous>, transform_indices = @transform_3, window_bounds = array<i64: 1, 128>}, {pipeline_mode = #tpu.pipeline_mode<synchronous>, transform_indices = @transform_4, window_bounds = array<i64: 104, 128>}]} {
    %c0_i32 = arith.constant 0 : i32
    %0 = arith.cmpi eq, %arg0, %c0_i32 : i32
    %1 = arith.extui %0 : i1 to i32
    %c0_i32_0 = arith.constant 0 : i32
    %2 = arith.cmpi ne, %1, %c0_i32_0 : i32
    scf.if %2 {
      %cst_10 = arith.constant 0.000000e+00 : f32
      %12 = vector.broadcast %cst_10 : f32 to vector<104x128xf32>
      %c0_11 = arith.constant 0 : index
      %c0_12 = arith.constant 0 : index
      %13 = vector.load %arg6[%c0_11, %c0_12] : memref<104x128xf32, #tpu.memory_space<vmem>>, vector<104x128xf32>
      tpu.vector_store %arg6[%c0_11, %c0_12], %12 {strides = array<i32>} : memref<104x128xf32, #tpu.memory_space<vmem>>, vector<104x128xf32>,
    } else {
    }
    %c0 = arith.constant 0 : index
    %c0_1 = arith.constant 0 : index
    %3 = vector.load %arg6[%c0, %c0_1] : memref<104x128xf32, #tpu.memory_space<vmem>>, vector<104x128xf32>
    %c0_2 = arith.constant 0 : index
    %c0_3 = arith.constant 0 : index
    %4 = vector.load %arg1[%c0_2, %c0_3] : memref<104x512xbf16, #tpu.memory_space<vmem>>, vector<104x512xbf16>
    %c0_4 = arith.constant 0 : index
    %c0_5 = arith.constant 0 : index
    %5 = vector.load %arg2[%c0_4, %c0_5] : memref<512x128xbf16, #tpu.memory_space<vmem>>, vector<512x128xbf16>
    %cst = arith.constant dense<0.000000e+00> : vector<104x128xf32>
    %6 = tpu.matmul %4, %5, %cst {dimension_numbers = #tpu.dot_dimension_numbers<[1], [0], [0], [1], [0, 0, 1, 1], [], []>} : vector<104x512xbf16>, vector<512x128xbf16>, vector<104x128xf32> -> vector<104x128xf32>
    %7 = arith.addf %3, %6 : vector<104x128xf32>
    %c0_6 = arith.constant 0 : index
    %c0_7 = arith.constant 0 : index
    %8 = vector.load %arg6[%c0_6, %c0_7] : memref<104x128xf32, #tpu.memory_space<vmem>>, vector<104x128xf32>
    tpu.vector_store %arg6[%c0_6, %c0_7], %7 {strides = array<i32>} : memref<104x128xf32, #tpu.memory_space<vmem>>, vector<104x128xf32>,
    %c0_i32_8 = arith.constant 0 : i32
    %9 = arith.cmpi eq, %arg0, %c0_i32_8 : i32
    %10 = arith.extui %9 : i1 to i32
    %c0_i32_9 = arith.constant 0 : i32
    %11 = arith.cmpi ne, %10, %c0_i32_9 : i32
    scf.if %11 {
      %c0_10 = arith.constant 0 : index
      %c0_11 = arith.constant 0 : index
      %12 = vector.load %arg6[%c0_10, %c0_11] : memref<104x128xf32, #tpu.memory_space<vmem>>, vector<104x128xf32>
      %13 = tpu.iota {dimensions = array<i32: 0>} : vector<104x128xi32>
      %c98_i32 = arith.constant 98 : i32
      %14 = vector.broadcast %c98_i32 : i32 to vector<104x128xi32>
      %15 = arith.cmpi slt, %13, %14 : vector<104x128xi32>
      %16 = arith.extui %15 : vector<104x128xi1> to vector<104x128xi32>
      %17 = arith.sitofp %16 : vector<104x128xi32> to vector<104x128xf32>
      %18 = arith.mulf %12, %17 : vector<104x128xf32>
      %cst_12 = arith.constant dense<0.000000e+00> : vector<128xf32>
      %19 = vector.multi_reduction <add>, %18, %cst_12 [0] : vector<104x128xf32> to vector<128xf32>
      %20 = vector.shape_cast %19 : vector<128xf32> to vector<1x128xf32>
      %cst_13 = arith.constant 0.0102040814 : f32
      %21 = vector.broadcast %cst_13 : f32 to vector<1x128xf32>
      %22 = arith.mulf %20, %21 : vector<1x128xf32>
      %23 = vector.broadcast %22 : vector<1x128xf32> to vector<104x128xf32>
      %24 = arith.subf %12, %23 : vector<104x128xf32>
      %25 = arith.mulf %24, %17 : vector<104x128xf32>
      %26 = arith.mulf %25, %25 : vector<104x128xf32>
      %cst_14 = arith.constant dense<0.000000e+00> : vector<128xf32>
      %27 = vector.multi_reduction <add>, %26, %cst_14 [0] : vector<104x128xf32> to vector<128xf32>
      %28 = vector.shape_cast %27 : vector<128xf32> to vector<1x128xf32>
      %cst_15 = arith.constant 0.0102040814 : f32
      %29 = vector.broadcast %cst_15 : f32 to vector<1x128xf32>
      %30 = arith.mulf %28, %29 : vector<1x128xf32>
      %cst_16 = arith.constant 9.99999974E-6 : f32
      %31 = vector.broadcast %cst_16 : f32 to vector<1x128xf32>
      %32 = arith.addf %30, %31 : vector<1x128xf32>
      %33 = math.rsqrt %32 : vector<1x128xf32>
      %c0_17 = arith.constant 0 : index
      %c0_18 = arith.constant 0 : index
      %34 = vector.load %arg3[%c0_17, %c0_18] : memref<1x128xf32, #tpu.memory_space<vmem>>, vector<1x128xf32>
      %35 = arith.mulf %34, %33 : vector<1x128xf32>
      %c0_19 = arith.constant 0 : index
      %c0_20 = arith.constant 0 : index
      %36 = vector.load %arg4[%c0_19, %c0_20] : memref<1x128xf32, #tpu.memory_space<vmem>>, vector<1x128xf32>
      %37 = arith.mulf %22, %35 : vector<1x128xf32>
      %38 = arith.subf %36, %37 : vector<1x128xf32>
      %39 = vector.broadcast %35 : vector<1x128xf32> to vector<104x128xf32>
      %40 = arith.mulf %12, %39 : vector<104x128xf32>
      %41 = vector.broadcast %38 : vector<1x128xf32> to vector<104x128xf32>
      %42 = arith.addf %40, %41 : vector<104x128xf32>
      %cst_21 = arith.constant 0.000000e+00 : f32
      %43 = vector.broadcast %cst_21 : f32 to vector<104x128xf32>
      %44 = arith.maximumf %42, %43 : vector<104x128xf32>
      %45 = arith.truncf %44 : vector<104x128xf32> to vector<104x128xbf16>
      %c0_22 = arith.constant 0 : index
      %c0_23 = arith.constant 0 : index
      %46 = vector.load %arg5[%c0_22, %c0_23] : memref<104x128xbf16, #tpu.memory_space<vmem>>, vector<104x128xbf16>
      tpu.vector_store %arg5[%c0_22, %c0_23], %45 {strides = array<i32>} : memref<104x128xbf16, #tpu.memory_space<vmem>>, vector<104x128xbf16>,
    } else {
    }
    return
  }
  func.func @transform_0(%arg0: i32) -> (i32, i32) {
    %c0_i32 = arith.constant 0 : i32
    %c0_i32_0 = arith.constant 0 : i32
    return %c0_i32, %arg0 : i32, i32
  }
  func.func @transform_1(%arg0: i32) -> (i32, i32) {
    %c0_i32 = arith.constant 0 : i32
    %c0_i32_0 = arith.constant 0 : i32
    return %arg0, %c0_i32 : i32, i32
  }
  func.func @transform_2(%arg0: i32) -> (i32, i32) {
    %c0_i32 = arith.constant 0 : i32
    %c0_i32_0 = arith.constant 0 : i32
    %c0_i32_1 = arith.constant 0 : i32
    return %c0_i32, %c0_i32_0 : i32, i32
  }
  func.func @transform_3(%arg0: i32) -> (i32, i32) {
    %c0_i32 = arith.constant 0 : i32
    %c0_i32_0 = arith.constant 0 : i32
    %c0_i32_1 = arith.constant 0 : i32
    return %c0_i32, %c0_i32_0 : i32, i32
  }
  func.func @transform_4(%arg0: i32) -> (i32, i32) {
    %c0_i32 = arith.constant 0 : i32
    %c0_i32_0 = arith.constant 0 : i32
    %c0_i32_1 = arith.constant 0 : i32
    return %c0_i32, %c0_i32_0 : i32, i32
  }
}

module attributes {stable_mosaic.version = 11 : i64} {
  func.func @_conv_bn_relu_kernel(%arg0: i32, %arg1: memref<8x128xbf16, #tpu.memory_space<vmem>>, %arg2: memref<128x128xbf16, #tpu.memory_space<vmem>>, %arg3: memref<1x128xf32, #tpu.memory_space<vmem>>, %arg4: memref<1x128xf32, #tpu.memory_space<vmem>>, %arg5: memref<8x128xbf16, #tpu.memory_space<vmem>>, %arg6: memref<8x128xf32, #tpu.memory_space<vmem>>) attributes {dimension_semantics = [#tpu.dimension_semantics<arbitrary>], iteration_bounds = array<i64: 7>, scalar_prefetch = 0 : i64, scratch_operands = 1 : i64, tpu.core_type = #tpu.core_type<tc>, window_params = [{transform_indices = @transform_0, window_bounds = array<i64: 8, 128>}, {transform_indices = @transform_1, window_bounds = array<i64: 128, 128>}, {pipeline_mode = #tpu.pipeline_mode<synchronous>, transform_indices = @transform_2, window_bounds = array<i64: 1, 128>}, {pipeline_mode = #tpu.pipeline_mode<synchronous>, transform_indices = @transform_3, window_bounds = array<i64: 1, 128>}, {pipeline_mode = #tpu.pipeline_mode<synchronous>, transform_indices = @transform_4, window_bounds = array<i64: 8, 128>}]} {
    %c0_i32 = arith.constant 0 : i32
    %0 = arith.cmpi eq, %arg0, %c0_i32 : i32
    %1 = arith.extui %0 : i1 to i32
    %c0_i32_0 = arith.constant 0 : i32
    %2 = arith.cmpi ne, %1, %c0_i32_0 : i32
    scf.if %2 {
      %cst_9 = arith.constant 0.000000e+00 : f32
      %12 = vector.broadcast %cst_9 : f32 to vector<8x128xf32>
      %c0_10 = arith.constant 0 : index
      %c0_11 = arith.constant 0 : index
      %13 = vector.load %arg6[%c0_10, %c0_11] : memref<8x128xf32, #tpu.memory_space<vmem>>, vector<8x128xf32>
      tpu.vector_store %arg6[%c0_10, %c0_11], %12 {strides = array<i32>} : memref<8x128xf32, #tpu.memory_space<vmem>>, vector<8x128xf32>,
    } else {
    }
    %c0 = arith.constant 0 : index
    %c0_1 = arith.constant 0 : index
    %3 = vector.load %arg6[%c0, %c0_1] : memref<8x128xf32, #tpu.memory_space<vmem>>, vector<8x128xf32>
    %c0_2 = arith.constant 0 : index
    %c0_3 = arith.constant 0 : index
    %4 = vector.load %arg1[%c0_2, %c0_3] : memref<8x128xbf16, #tpu.memory_space<vmem>>, vector<8x128xbf16>
    %c0_4 = arith.constant 0 : index
    %c0_5 = arith.constant 0 : index
    %5 = vector.load %arg2[%c0_4, %c0_5] : memref<128x128xbf16, #tpu.memory_space<vmem>>, vector<128x128xbf16>
    %cst = arith.constant dense<0.000000e+00> : vector<8x128xf32>
    %6 = tpu.matmul %4, %5, %cst {dimension_numbers = #tpu.dot_dimension_numbers<[1], [0], [0], [1], [0, 0, 1, 1], [], []>} : vector<8x128xbf16>, vector<128x128xbf16>, vector<8x128xf32> -> vector<8x128xf32>
    %7 = arith.addf %3, %6 : vector<8x128xf32>
    %c0_6 = arith.constant 0 : index
    %c0_7 = arith.constant 0 : index
    %8 = vector.load %arg6[%c0_6, %c0_7] : memref<8x128xf32, #tpu.memory_space<vmem>>, vector<8x128xf32>
    tpu.vector_store %arg6[%c0_6, %c0_7], %7 {strides = array<i32>} : memref<8x128xf32, #tpu.memory_space<vmem>>, vector<8x128xf32>,
    %c6_i32 = arith.constant 6 : i32
    %9 = arith.cmpi eq, %arg0, %c6_i32 : i32
    %10 = arith.extui %9 : i1 to i32
    %c0_i32_8 = arith.constant 0 : i32
    %11 = arith.cmpi ne, %10, %c0_i32_8 : i32
    scf.if %11 {
      %c0_9 = arith.constant 0 : index
      %c0_10 = arith.constant 0 : index
      %12 = vector.load %arg6[%c0_9, %c0_10] : memref<8x128xf32, #tpu.memory_space<vmem>>, vector<8x128xf32>
      %13 = tpu.iota {dimensions = array<i32: 0>} : vector<8x128xi32>
      %c8_i32 = arith.constant 8 : i32
      %14 = vector.broadcast %c8_i32 : i32 to vector<8x128xi32>
      %15 = arith.cmpi slt, %13, %14 : vector<8x128xi32>
      %16 = arith.extui %15 : vector<8x128xi1> to vector<8x128xi32>
      %17 = arith.sitofp %16 : vector<8x128xi32> to vector<8x128xf32>
      %18 = arith.mulf %12, %17 : vector<8x128xf32>
      %cst_11 = arith.constant dense<0.000000e+00> : vector<128xf32>
      %19 = vector.multi_reduction <add>, %18, %cst_11 [0] : vector<8x128xf32> to vector<128xf32>
      %20 = vector.shape_cast %19 : vector<128xf32> to vector<1x128xf32>
      %cst_12 = arith.constant 1.250000e-01 : f32
      %21 = vector.broadcast %cst_12 : f32 to vector<1x128xf32>
      %22 = arith.mulf %20, %21 : vector<1x128xf32>
      %23 = vector.broadcast %22 : vector<1x128xf32> to vector<8x128xf32>
      %24 = arith.subf %12, %23 : vector<8x128xf32>
      %25 = arith.mulf %24, %17 : vector<8x128xf32>
      %26 = arith.mulf %25, %25 : vector<8x128xf32>
      %cst_13 = arith.constant dense<0.000000e+00> : vector<128xf32>
      %27 = vector.multi_reduction <add>, %26, %cst_13 [0] : vector<8x128xf32> to vector<128xf32>
      %28 = vector.shape_cast %27 : vector<128xf32> to vector<1x128xf32>
      %cst_14 = arith.constant 1.250000e-01 : f32
      %29 = vector.broadcast %cst_14 : f32 to vector<1x128xf32>
      %30 = arith.mulf %28, %29 : vector<1x128xf32>
      %cst_15 = arith.constant 9.99999974E-6 : f32
      %31 = vector.broadcast %cst_15 : f32 to vector<1x128xf32>
      %32 = arith.addf %30, %31 : vector<1x128xf32>
      %33 = math.rsqrt %32 : vector<1x128xf32>
      %c0_16 = arith.constant 0 : index
      %c0_17 = arith.constant 0 : index
      %34 = vector.load %arg3[%c0_16, %c0_17] : memref<1x128xf32, #tpu.memory_space<vmem>>, vector<1x128xf32>
      %35 = arith.mulf %34, %33 : vector<1x128xf32>
      %c0_18 = arith.constant 0 : index
      %c0_19 = arith.constant 0 : index
      %36 = vector.load %arg4[%c0_18, %c0_19] : memref<1x128xf32, #tpu.memory_space<vmem>>, vector<1x128xf32>
      %37 = arith.mulf %22, %35 : vector<1x128xf32>
      %38 = arith.subf %36, %37 : vector<1x128xf32>
      %39 = vector.broadcast %35 : vector<1x128xf32> to vector<8x128xf32>
      %40 = arith.mulf %12, %39 : vector<8x128xf32>
      %41 = vector.broadcast %38 : vector<1x128xf32> to vector<8x128xf32>
      %42 = arith.addf %40, %41 : vector<8x128xf32>
      %cst_20 = arith.constant 0.000000e+00 : f32
      %43 = vector.broadcast %cst_20 : f32 to vector<8x128xf32>
      %44 = arith.maximumf %42, %43 : vector<8x128xf32>
      %45 = arith.truncf %44 : vector<8x128xf32> to vector<8x128xbf16>
      %c0_21 = arith.constant 0 : index
      %c0_22 = arith.constant 0 : index
      %46 = vector.load %arg5[%c0_21, %c0_22] : memref<8x128xbf16, #tpu.memory_space<vmem>>, vector<8x128xbf16>
      tpu.vector_store %arg5[%c0_21, %c0_22], %45 {strides = array<i32>} : memref<8x128xbf16, #tpu.memory_space<vmem>>, vector<8x128xbf16>,
    } else {
    }
    return
  }
  func.func @transform_0(%arg0: i32) -> (i32, i32) {
    %c0_i32 = arith.constant 0 : i32
    %c0_i32_0 = arith.constant 0 : i32
    return %c0_i32, %arg0 : i32, i32
  }
  func.func @transform_1(%arg0: i32) -> (i32, i32) {
    %c0_i32 = arith.constant 0 : i32
    %c0_i32_0 = arith.constant 0 : i32
    return %arg0, %c0_i32 : i32, i32
  }
  func.func @transform_2(%arg0: i32) -> (i32, i32) {
    %c0_i32 = arith.constant 0 : i32
    %c0_i32_0 = arith.constant 0 : i32
    %c0_i32_1 = arith.constant 0 : i32
    return %c0_i32, %c0_i32_0 : i32, i32
  }
  func.func @transform_3(%arg0: i32) -> (i32, i32) {
    %c0_i32 = arith.constant 0 : i32
    %c0_i32_0 = arith.constant 0 : i32
    %c0_i32_1 = arith.constant 0 : i32
    return %c0_i32, %c0_i32_0 : i32, i32
  }
  func.func @transform_4(%arg0: i32) -> (i32, i32) {
    %c0_i32 = arith.constant 0 : i32
    %c0_i32_0 = arith.constant 0 : i32
    %c0_i32_1 = arith.constant 0 : i32
    return %c0_i32, %c0_i32_0 : i32, i32
  }
}

module attributes {stable_mosaic.version = 11 : i64} {
  func.func @_linear_kernel(%arg0: memref<8x128xbf16, #tpu.memory_space<vmem>>, %arg1: memref<128x128xbf16, #tpu.memory_space<vmem>>, %arg2: memref<1x128xf32, #tpu.memory_space<vmem>>, %arg3: memref<8x128xf32, #tpu.memory_space<vmem>>) attributes {dimension_semantics = [], scalar_prefetch = 0 : i64, scratch_operands = 0 : i64, tpu.core_type = #tpu.core_type<tc>} {
    %c0 = arith.constant 0 : index
    %c0_0 = arith.constant 0 : index
    %0 = vector.load %arg0[%c0, %c0_0] : memref<8x128xbf16, #tpu.memory_space<vmem>>, vector<8x128xbf16>
    %c0_1 = arith.constant 0 : index
    %c0_2 = arith.constant 0 : index
    %1 = vector.load %arg1[%c0_1, %c0_2] : memref<128x128xbf16, #tpu.memory_space<vmem>>, vector<128x128xbf16>
    %cst = arith.constant dense<0.000000e+00> : vector<8x128xf32>
    %2 = tpu.matmul %0, %1, %cst {dimension_numbers = #tpu.dot_dimension_numbers<[1], [0], [0], [1], [0, 0, 1, 1], [], []>} : vector<8x128xbf16>, vector<128x128xbf16>, vector<8x128xf32> -> vector<8x128xf32>
    %c0_3 = arith.constant 0 : index
    %c0_4 = arith.constant 0 : index
    %3 = vector.load %arg2[%c0_3, %c0_4] : memref<1x128xf32, #tpu.memory_space<vmem>>, vector<1x128xf32>
    %4 = vector.broadcast %3 : vector<1x128xf32> to vector<8x128xf32>
    %5 = arith.addf %2, %4 : vector<8x128xf32>
    %c0_5 = arith.constant 0 : index
    %c0_6 = arith.constant 0 : index
    %6 = vector.load %arg3[%c0_5, %c0_6] : memref<8x128xf32, #tpu.memory_space<vmem>>, vector<8x128xf32>
    tpu.vector_store %arg3[%c0_5, %c0_6], %5 {strides = array<i32>} : memref<8x128xf32, #tpu.memory_space<vmem>>, vector<8x128xf32>,
    return
  }
}

</mosaic_0001>

<bundles_post_ra>
// kernel: dqn_forward.4
= control target key start
LH: loop header
LB: loop body
LE: loop exit
PB: predicated region body
PF: predicated region fallthrough
CT: control target
= control target key end

     0   :  { %s4211_s1 = inlined_call_operand.vmem [shape: bf16[128,128], index: 1, kind: input, shape index: {}]   ;;  %s4212_s0 = inlined_call_operand.vmem [shape: bf16[648,128], index: 0, kind: input, shape index: {}]   ;;  %s4213_s2 = inlined_call_operand.vmem [shape: f32[1,128], index: 2, kind: input, shape index: {}]   ;;  %s4214_s3 = inlined_call_operand.vmem [shape: f32[1,128], index: 3, kind: input, shape index: {}]   ;;  %s4215_s4 = inlined_call_operand.vmem [shape: bf16[648,128], index: 4, kind: output, shape index: {}]  }
   0x1   :  { %v2524_v0 = vld [vmem:[%s4211_s1 + $0x38] sm:$0xff]  ;;  %v2523_v1 = vld [vmem:[%s4211_s1 + $0x30] sm:$0xff]  ;;  %v2522_v2 = vld [vmem:[%s4211_s1 + $0x28] sm:$0xff] }
   0x2   :  { %572 = vmatpush.bf16.msra.mxu0 %v2524_v0  ;;  %2764 = vmatpush.bf16.msra.mxu1 %v2524_v0  ;;  %v2521_v3 = vld [vmem:[%s4211_s1 + $0x20] sm:$0xff]  ;;  %v2520_v4 = vld [vmem:[%s4211_s1 + $0x18] sm:$0xff]  ;;  %v2519_v5 = vld [vmem:[%s4211_s1 + $0x10] sm:$0xff] }
   0x3   :  { %2765 = vmatpush.bf16.msra.mxu2 %v2524_v0  ;;  %2766 = vmatpush.bf16.msra.mxu3 %v2524_v0  ;;  %v2518_v6 = vld [vmem:[%s4211_s1 + $0x8] sm:$0xff]  ;;  %v2517_v7 = vld [vmem:[%s4211_s1] sm:$0xff]  ;;  %v2487_v9 = vld [vmem:[%s4212_s0 + $0x50] sm:$0xff] }
   0x4   :  { %v2477_v8 = vld [vmem:[%s4212_s0] sm:$0xff]  ;;  %v2478_v10 = vld [vmem:[%s4212_s0 + $0x8] sm:$0xff]  ;;  %v2488_v11 = vld [vmem:[%s4212_s0 + $0x58] sm:$0xff] }
   0x5   :  { %v2497_v12 = vld [vmem:[%s4212_s0 + $0xa0] sm:$0xff]  ;;  %v2479_v13 = vld [vmem:[%s4212_s0 + $0x10] sm:$0xff]  ;;  %v2498_v15 = vld [vmem:[%s4212_s0 + $0xa8] sm:$0xff] }
   0x6   :  { %573 = vmatpush.bf16.msra.mxu0 %v2523_v1  ;;  %2767 = vmatpush.bf16.msra.mxu1 %v2523_v1  ;;  %v2489_v14 = vld [vmem:[%s4212_s0 + $0x60] sm:$0xff]  ;;  %v2480_v16 = vld [vmem:[%s4212_s0 + $0x18] sm:$0xff]  ;;  %v2490_v17 = vld [vmem:[%s4212_s0 + $0x68] sm:$0xff] }
   0x7   :  { %2768 = vmatpush.bf16.msra.mxu2 %v2523_v1  ;;  %2769 = vmatpush.bf16.msra.mxu3 %v2523_v1  ;;  %v2499_v18 = vld [vmem:[%s4212_s0 + $0xb0] sm:$0xff]  ;;  %v2481_v19 = vld [vmem:[%s4212_s0 + $0x20] sm:$0xff]  ;;  %v2500_v21 = vld [vmem:[%s4212_s0 + $0xb8] sm:$0xff] }
   0x8   :  { %v2491_v20 = vld [vmem:[%s4212_s0 + $0x70] sm:$0xff]  ;;  %v2482_v22 = vld [vmem:[%s4212_s0 + $0x28] sm:$0xff]  ;;  %v2492_v23 = vld [vmem:[%s4212_s0 + $0x78] sm:$0xff] }
   0x9   :  { %v2508_v24 = vld [vmem:[%s4212_s0 + $0xf8] sm:$0xff]  ;;  %v2501_v25 = vld [vmem:[%s4212_s0 + $0xc0] sm:$0xff]  ;;  %v2483_v26 = vld [vmem:[%s4212_s0 + $0x30] sm:$0xff] }
   0xa   :  { %574 = vmatpush.bf16.msra.mxu0 %v2522_v2  ;;  %2770 = vmatpush.bf16.msra.mxu1 %v2522_v2  ;;  %v2493_v27 = vld [vmem:[%s4212_s0 + $0x80] sm:$0xff]  ;;  %v2502_v29 = vld [vmem:[%s4212_s0 + $0xc8] sm:$0xff]  ;;  %v2484_v30 = vld [vmem:[%s4212_s0 + $0x38] sm:$0xff] }
   0xb   :  { %2771 = vmatpush.bf16.msra.mxu2 %v2522_v2  ;;  %2772 = vmatpush.bf16.msra.mxu3 %v2522_v2  ;;  %v2509_v28 = vld [vmem:[%s4212_s0 + $0x100] sm:$0xff]  ;;  %v2494_v31 = vld [vmem:[%s4212_s0 + $0x88] sm:$0xff]  ;;  %v2503_v33 = vld [vmem:[%s4212_s0 + $0xd0] sm:$0xff] }
   0xc   :  { %v2510_v32 = vld [vmem:[%s4212_s0 + $0x108] sm:$0xff]  ;;  %v2485_v34 = vld [vmem:[%s4212_s0 + $0x40] sm:$0xff]  ;;  %v2495_v36 = vld [vmem:[%s4212_s0 + $0x90] sm:$0xff] }
   0xd   :  { %v2511_v37 = vld [vmem:[%s4212_s0 + $0x110] sm:$0xff]  ;;  %v2504_v39 = vld [vmem:[%s4212_s0 + $0xd8] sm:$0xff]  ;;  %v2486_v42 = vld [vmem:[%s4212_s0 + $0x48] sm:$0xff] }
   0xe   :  { %575 = vmatpush.bf16.msra.mxu0 %v2521_v3  ;;  %2773 = vmatpush.bf16.msra.mxu1 %v2521_v3  ;;  %v2496_v44 = vld [vmem:[%s4212_s0 + $0x98] sm:$0xff]  ;;  %v2505_v47 = vld [vmem:[%s4212_s0 + $0xe0] sm:$0xff]  ;;  %v2506_v54 = vld [vmem:[%s4212_s0 + $0xe8] sm:$0xff] }
   0xf   :  { %2774 = vmatpush.bf16.msra.mxu2 %v2521_v3  ;;  %2775 = vmatpush.bf16.msra.mxu3 %v2521_v3  ;;  %v2512_v45 = vld [vmem:[%s4212_s0 + $0x118] sm:$0xff]  ;;  %v2513_v52 = vld [vmem:[%s4212_s0 + $0x120] sm:$0xff]  ;;  %v2514_v59 = vld [vmem:[%s4212_s0 + $0x128] sm:$0xff] }
  0x10   :  { %v2507_v61 = vld [vmem:[%s4212_s0 + $0xf0] sm:$0xff] }
  0x11   :  { %v2515_v2 = vld [vmem:[%s4212_s0 + $0x130] sm:$0xff] }
  0x12   :  { %576 = vmatpush.bf16.msra.mxu0 %v2520_v4  ;;  %2776 = vmatpush.bf16.msra.mxu1 %v2520_v4 }
  0x13   :  { %2777 = vmatpush.bf16.msra.mxu2 %v2520_v4  ;;  %2778 = vmatpush.bf16.msra.mxu3 %v2520_v4 }
  0x16   :  { %577 = vmatpush.bf16.msra.mxu0 %v2519_v5  ;;  %2779 = vmatpush.bf16.msra.mxu1 %v2519_v5 }
  0x17   :  { %2780 = vmatpush.bf16.msra.mxu2 %v2519_v5  ;;  %2781 = vmatpush.bf16.msra.mxu3 %v2519_v5 }
  0x1a   :  { %578 = vmatpush.bf16.msra.mxu0 %v2518_v6  ;;  %2782 = vmatpush.bf16.msra.mxu1 %v2518_v6 }
  0x1b   :  { %2783 = vmatpush.bf16.msra.mxu2 %v2518_v6  ;;  %2784 = vmatpush.bf16.msra.mxu3 %v2518_v6 }
  0x1e   :  { %579 = vmatpush.bf16.msra.mxu0 %v2517_v7  ;;  %2785 = vmatpush.bf16.msra.mxu1 %v2517_v7 }
  0x1f   :  { %2786 = vmatpush.bf16.msra.mxu2 %v2517_v7  ;;  %2787 = vmatpush.bf16.msra.mxu3 %v2517_v7 }
  0x21   :  { %580 = vmatmul.bf16.vlgmr.msra.gmra.mxu0 %v2477_v8  ;;  %630 = vmatmul.bf16.vlgmr.msra.gmra.mxu1 %v2487_v9  ;;  %v2516_v8 = vld [vmem:[%s4212_s0 + $0x138] sm:$0xff] }
  0x22   :  { %680 = vmatmul.bf16.vlgmr.msra.gmra.mxu2 %v2497_v12  ;;  %735 = vmatmul.bf16.vlgmr.msra.gmra.mxu3 %v2508_v24 }
  0x31   :  { %585 = vmatmul.bf16.gmra.mxu0 %v2478_v10  ;;  %635 = vmatmul.bf16.gmra.mxu1 %v2488_v11 }
  0x32   :  { %685 = vmatmul.bf16.gmra.mxu2 %v2498_v15  ;;  %740 = vmatmul.bf16.gmra.mxu3 %v2509_v28 }
  0x41   :  { %590 = vmatmul.bf16.gmra.mxu0 %v2479_v13  ;;  %640 = vmatmul.bf16.gmra.mxu1 %v2489_v14 }
  0x42   :  { %690 = vmatmul.bf16.gmra.mxu2 %v2499_v18  ;;  %745 = vmatmul.bf16.gmra.mxu3 %v2510_v32 }
  0x51   :  { %595 = vmatmul.bf16.gmra.mxu0 %v2480_v16  ;;  %645 = vmatmul.bf16.gmra.mxu1 %v2490_v17  ;;  %v263_v17 = vld [vmem:[%s4212_s0 + $0x140] sm:$0xf] }
  0x52   :  { %695 = vmatmul.bf16.gmra.mxu2 %v2500_v21  ;;  %750 = vmatmul.bf16.gmra.mxu3 %v2511_v37  ;;  %v441_v18 = vunpack.c.l.b16 %v263_v17 }
  0x61   :  { %600 = vmatmul.bf16.gmra.mxu0 %v2481_v19  ;;  %650 = vmatmul.bf16.gmra.mxu1 %v2491_v20  ;;  %v482_v19 = vpack.c.b16 %v441_v18, %v441_v18 }
  0x62   :  { %700 = vmatmul.bf16.gmra.mxu2 %v2501_v25  ;;  %755 = vmatmul.bf16.gmra.mxu3 %v2512_v45 }
  0x71   :  { %605 = vmatmul.bf16.gmra.mxu0 %v2482_v22  ;;  %655 = vmatmul.bf16.gmra.mxu1 %v2492_v23 }
  0x72   :  { %705 = vmatmul.bf16.gmra.mxu2 %v2502_v29  ;;  %760 = vmatmul.bf16.gmra.mxu3 %v2513_v52 }
  0x81   :  { %610 = vmatmul.bf16.gmra.mxu0 %v2483_v26  ;;  %660 = vmatmul.bf16.gmra.mxu1 %v2493_v27 }
  0x82   :  { %710 = vmatmul.bf16.gmra.mxu2 %v2503_v33  ;;  %765 = vmatmul.bf16.gmra.mxu3 %v2514_v59 }
  0x91   :  { %615 = vmatmul.bf16.gmra.mxu0 %v2484_v30  ;;  %665 = vmatmul.bf16.gmra.mxu1 %v2494_v31 }
  0x92   :  { %715 = vmatmul.bf16.gmra.mxu2 %v2504_v39  ;;  %770 = vmatmul.bf16.gmra.mxu3 %v2515_v2 }
  0x9e   :  { %v2920_v35 = vpop.f32.mrf.mxu0  ;;  %v2928_v38 = vpop.f32.mrf.mxu1 }
  0x9f   :  { %4302 = vst [vmem:[#allocation3_spill] sm:$0xff] %v2928_v38 }
  0xa1   :  { %620 = vmatmul.bf16.gmra.mxu0 %v2485_v34  ;;  %670 = vmatmul.bf16.gmra.mxu1 %v2495_v36 }
  0xa2   :  { %720 = vmatmul.bf16.gmra.mxu2 %v2505_v47  ;;  %775 = vmatmul.bf16.gmra.mxu3 %v2516_v8 }
  0xa5   :  { %v2955_v49 = vpop.f32.mrf.mxu2  ;;  %v3015_v12 = vpop.f32.mrf.mxu3 }
  0xa6   :  { %v2933_v40 = vpop.f32.mrf.mxu0  ;;  %v2935_v41 = vpop.f32.mrf.mxu1  ;;  %4306 = vst [vmem:[#allocation7_spill] sm:$0xff] %v2955_v49 }
  0xa7   :  { %v1437_v28 = vadd.f32 %v2933_v40, %v2920_v35 }
  0xad   :  { %v2964_v53 = vpop.f32.mrf.mxu2  ;;  %v3023_v16 = vpop.f32.mrf.mxu3 }
  0xae   :  { %v2940_v43 = vpop.f32.mrf.mxu0  ;;  %v2948_v46 = vpop.f32.mrf.mxu1 }
  0xaf   :  { %4303 = vst [vmem:[#allocation4_spill] sm:$0xff] %v2940_v43  ;;  %v1438_v29 = vadd.f32 %v1437_v28, %v2940_v43 }
  0xb0   :  { %4304 = vst [vmem:[#allocation5_spill] sm:$0xff] %v2948_v46 }
  0xb1   :  { %625 = vmatmul.bf16.gmra.mxu0 %v2486_v42  ;;  %675 = vmatmul.bf16.gmra.mxu1 %v2496_v44 }
  0xb2   :  { %725 = vmatmul.bf16.gmra.mxu2 %v2506_v54  ;;  %780 = vmatmul.bf16.gmra.mxu3 %v482_v19 }
  0xb5   :  { %v2973_v57 = vpop.f32.mrf.mxu2  ;;  %v3032_v22 = vpop.f32.mrf.mxu3 }
  0xb6   :  { %v2953_v48 = vpop.f32.mrf.mxu0  ;;  %v2959_v51 = vpop.f32.mrf.mxu1  ;;  %4310 = vst [vmem:[#allocation11_spill] sm:$0xff] %v2973_v57 }
  0xb7   :  { %4305 = vst [vmem:[#allocation6_spill] sm:$0xff] %v2953_v48  ;;  %v1439_v31 = vadd.f32 %v1438_v29, %v2953_v48 }
  0xb8   :  { %4308 = vst [vmem:[#allocation9_spill] sm:$0xff] %v2959_v51 }
  0xbd   :  { %v2987_v63 = vpop.f32.mrf.mxu2  ;;  %v3040_v26 = vpop.f32.mrf.mxu3 }
  0xbe   :  { %v2957_v50 = vpop.f32.mrf.mxu0  ;;  %v2971_v56 = vpop.f32.mrf.mxu1  ;;  %4311 = vst [vmem:[#allocation12_spill] sm:$0xff] %v2987_v63 }
  0xbf   :  { %4307 = vst [vmem:[#allocation8_spill] sm:$0xff] %v2957_v50  ;;  %v1440_v34 = vadd.f32 %v1439_v31, %v2957_v50 }
  0xc0   :  { %4309 = vst [vmem:[#allocation10_spill] sm:$0xff] %v2971_v56 }
  0xc2   :  { %730 = vmatmul.bf16.gmra.mxu2 %v2507_v61 }
  0xc5   :  { %v2996_v3 = vpop.f32.mrf.mxu2  ;;  %v3052_v33 = vpop.f32.mrf.mxu3 }
  0xc6   :  { %v2969_v55 = vpop.f32.mrf.mxu0  ;;  %v2980_v60 = vpop.f32.mrf.mxu1  ;;  %4313 = vst [vmem:[#allocation14_spill] sm:$0xff] %v2996_v3 }
  0xc7   :  { %v1441_v36 = vadd.f32 %v1440_v34, %v2969_v55 }
  0xcd   :  { %v3002_v6 = vpop.f32.mrf.mxu2  ;;  %v3062_v45 = vpop.f32.mrf.mxu3 }
  0xce   :  { %v2975_v58 = vpop.f32.mrf.mxu0  ;;  %v2989_v0 = vpop.f32.mrf.mxu1  ;;  %4329 = vst [vmem:[#allocation30_spill] sm:$0xff] %v3062_v45 }
  0xcf   :  { %4312 = vst [vmem:[#allocation13_spill] sm:$0xff] %v2989_v0  ;;  %v1442_v39 = vadd.f32 %v1441_v36, %v2975_v58 }
  0xd5   :  { %v3011_v10 = vpop.f32.mrf.mxu2  ;;  %v3074_v17 = vpop.f32.mrf.mxu3 }
  0xd6   :  { %v2985_v62 = vpop.f32.mrf.mxu0  ;;  %v3000_v5 = vpop.f32.mrf.mxu1  ;;  %4317 = vst [vmem:[#allocation18_spill] sm:$0xff] %v3011_v10 }
  0xd7   :  { %4314 = vst [vmem:[#allocation15_spill] sm:$0xff] %v3000_v5  ;;  %v1443_v44 = vadd.f32 %v1442_v39, %v2985_v62 }
  0xd8   :  { %4332 = vst [vmem:[#allocation33_spill] sm:$0xff] %v3074_v17 }
  0xdd   :  { %v3021_v15 = vpop.f32.mrf.mxu2  ;;  %v3086_v39 = vpop.f32.mrf.mxu3 }
  0xde   :  { %v2991_v1 = vpop.f32.mrf.mxu0  ;;  %v3009_v9 = vpop.f32.mrf.mxu1  ;;  %4320 = vst [vmem:[#allocation21_spill] sm:$0xff] %v3021_v15 }
  0xdf   :  { %4316 = vst [vmem:[#allocation17_spill] sm:$0xff] %v3009_v9  ;;  %v1444_v47 = vadd.f32 %v1443_v44, %v2991_v1 }
  0xe0   :  { %4335 = vst [vmem:[#allocation36_spill] sm:$0xff] %v3086_v39 }
  0xe5   :  { %v3034_v23 = vpop.f32.mrf.mxu2 }
  0xe6   :  { %v2998_v4 = vpop.f32.mrf.mxu0  ;;  %v3017_v13 = vpop.f32.mrf.mxu1 }
  0xe7   :  { %v1445_v54 = vadd.f32 %v1444_v47, %v2998_v4 }
  0xed   :  { %v3042_v27 = vpop.f32.mrf.mxu2 }
  0xee   :  { %v3004_v7 = vpop.f32.mrf.mxu0  ;;  %v3028_v20 = vpop.f32.mrf.mxu1 }
  0xef   :  { %4315 = vst [vmem:[#allocation16_spill] sm:$0xff] %v3004_v7  ;;  %v1446_v59 = vadd.f32 %v1445_v54, %v3004_v7 }
  0xf0   :  { %4321 = vst [vmem:[#allocation22_spill] sm:$0xff] %v3028_v20 }
  0xf5   :  { %v3056_v37 = vpop.f32.mrf.mxu2 }
  0xf6   :  { %v3013_v11 = vpop.f32.mrf.mxu0  ;;  %v3038_v25 = vpop.f32.mrf.mxu1  ;;  %4327 = vst [vmem:[#allocation28_spill] sm:$0xff] %v3056_v37 }
  0xf7   :  { %4318 = vst [vmem:[#allocation19_spill] sm:$0xff] %v3013_v11  ;;  %v1447_v8 = vadd.f32 %v1446_v59, %v3013_v11 }
  0xf8   :  { %4324 = vst [vmem:[#allocation25_spill] sm:$0xff] %v3038_v25 }
  0xfd   :  { %v3071_v2 = vpop.f32.mrf.mxu2 }
  0xfe   :  { %v3019_v14 = vpop.f32.mrf.mxu0  ;;  %v3050_v32 = vpop.f32.mrf.mxu1  ;;  %4331 = vst [vmem:[#allocation32_spill] sm:$0xff] %v3071_v2 }
  0xff   :  { %4319 = vst [vmem:[#allocation20_spill] sm:$0xff] %v3019_v14  ;;  %v1448_v18 = vadd.f32 %v1447_v8, %v3019_v14 }
 0x100   :  { %4326 = vst [vmem:[#allocation27_spill] sm:$0xff] %v3050_v32 }
 0x105   :  { %v3084_v36 = vpop.f32.mrf.mxu2 }
 0x106   :  { %v3030_v21 = vpop.f32.mrf.mxu0  ;;  %v3065_v52 = vpop.f32.mrf.mxu1 }
 0x107   :  { %4322 = vst [vmem:[#allocation23_spill] sm:$0xff] %v3030_v21  ;;  %v1449_v19 = vadd.f32 %v1448_v18, %v3030_v21 }
 0x10e   :  { %v3036_v24 = vpop.f32.mrf.mxu0  ;;  %v3078_v28 = vpop.f32.mrf.mxu1 }
 0x10f   :  { %4323 = vst [vmem:[#allocation24_spill] sm:$0xff] %v3036_v24  ;;  %v1450_v29 = vadd.f32 %v1449_v19, %v3036_v24  ;;  %v3096_v19 = vpop.f32.mrf.mxu3 }
 0x110   :  { %4333 = vst [vmem:[#allocation34_spill] sm:$0xff] %v3078_v28 }
 0x116   :  { %v3047_v30 = vpop.f32.mrf.mxu0  ;;  %v3093_v8 = vpop.f32.mrf.mxu1 }
 0x117   :  { %4325 = vst [vmem:[#allocation26_spill] sm:$0xff] %v3047_v30  ;;  %v1451_v34 = vadd.f32 %v1450_v29, %v3047_v30  ;;  %v3099_v30 = vpop.f32.mrf.mxu2 }
 0x118   :  { %4337 = vst [vmem:[#allocation38_spill] sm:$0xff] %v3093_v8 }
 0x11e   :  { %v3059_v42 = vpop.f32.mrf.mxu0 }
 0x11f   :  { %4328 = vst [vmem:[#allocation29_spill] sm:$0xff] %v3059_v42  ;;  %v1452_v44 = vadd.f32 %v1451_v34, %v3059_v42 }
 0x126   :  { %v3069_v61 = vpop.f32.mrf.mxu0 }
 0x127   :  { %4330 = vst [vmem:[#allocation31_spill] sm:$0xff] %v3069_v61  ;;  %v1453_v47 = vadd.f32 %v1452_v44, %v3069_v61  ;;  %v3104_v61 = vpop.f32.mrf.mxu1 }
 0x128   :  { %4338 = vst [vmem:[#allocation39_spill] sm:$0xff] %v3104_v61 }
 0x12e   :  { %v3081_v31 = vpop.f32.mrf.mxu0 }
 0x12f   :  { %4334 = vst [vmem:[#allocation35_spill] sm:$0xff] %v3081_v31  ;;  %v1454_v54 = vadd.f32 %v1453_v47, %v3081_v31  ;;  %v3106_v47 = vpop.f32.mrf.mxu3 }
 0x130   :  { %4339 = vst [vmem:[#allocation40_spill] sm:$0xff] %v3106_v47 }
 0x136   :  { %v3091_v59 = vpop.f32.mrf.mxu0 }
 0x137   :  { %4336 = vst [vmem:[#allocation37_spill] sm:$0xff] %v3091_v59  ;;  %v1455_v18 = vadd.f32 %v1454_v54, %v3091_v59  ;;  %v3110_v59 = vpop.f32.mrf.mxu2  ;;  %v3114_v42 = vpop.f32.mrf.mxu3 }
 0x138   :  { %4340 = vst [vmem:[#allocation41_spill] sm:$0xff] %v3110_v59 }
 0x139   :  { %v1456_v29 = vadd.f32 %v1455_v18, %v2928_v38  ;;  %4341 = vst [vmem:[#allocation42_spill] sm:$0xff] %v3114_v42 }
 0x13b   :  { %v1457_v24 = vadd.f32 %v1456_v29, %v2935_v41  ;;  %v3117_v29 = vpop.f32.mrf.mxu1 }
 0x13d   :  { %v1458_v34 = vadd.f32 %v1457_v24, %v2948_v46 }
 0x13f   :  { %v1459_v44 = vadd.f32 %v1458_v34, %v2959_v51  ;;  %v3121_v46 = vpop.f32.mrf.mxu2 }
 0x140   :  { %4342 = vst [vmem:[#allocation43_spill] sm:$0xff] %v3121_v46 }
 0x141   :  { %v1460_v31 = vadd.f32 %v1459_v44, %v2971_v56  ;;  %v3124_v44 = vpop.f32.mrf.mxu3 }
 0x142   :  { %4343 = vst [vmem:[#allocation44_spill] sm:$0xff] %v3124_v44 }
 0x143   :  { %v1461_v54 = vadd.f32 %v1460_v31, %v2980_v60 }
 0x145   :  { %v1462_v18 = vadd.f32 %v1461_v54, %v2989_v0 }
 0x147   :  { %v1463_v38 = vadd.f32 %v1462_v18, %v3000_v5  ;;  %v3128_v5 = vpop.f32.mrf.mxu1  ;;  %v3132_v0 = vpop.f32.mrf.mxu2 }
 0x148   :  { %4344 = vst [vmem:[#allocation45_spill] sm:$0xff] %v3128_v5 }
 0x149   :  { %v1464_v24 = vadd.f32 %v1463_v38, %v3009_v9  ;;  %4345 = vst [vmem:[#allocation46_spill] sm:$0xff] %v3132_v0 }
 0x14b   :  { %v1465_v34 = vadd.f32 %v1464_v24, %v3017_v13  ;;  %v3134_v24 = vpop.f32.mrf.mxu3 }
 0x14c   :  { %4346 = vst [vmem:[#allocation47_spill] sm:$0xff] %v3134_v24 }
 0x14d   :  { %v1466_v51 = vadd.f32 %v1465_v34, %v3028_v20 }
 0x14f   :  { %v1467_v31 = vadd.f32 %v1466_v51, %v3038_v25  ;;  %v3139_v20 = vpop.f32.mrf.mxu1 }
 0x150   :  { %4347 = vst [vmem:[#allocation48_spill] sm:$0xff] %v3139_v20 }
 0x151   :  { %v1468_v54 = vadd.f32 %v1467_v31, %v3050_v32 }
 0x153   :  { %v1469_v18 = vadd.f32 %v1468_v54, %v3065_v52  ;;  %v3142_v54 = vpop.f32.mrf.mxu3 }
 0x154   :  { %4348 = vst [vmem:[#allocation49_spill] sm:$0xff] %v3142_v54 }
 0x155   :  { %v1470_v38 = vadd.f32 %v1469_v18, %v3078_v28  ;;  %v3145_v28 = vpop.f32.mrf.mxu2 }
 0x157   :  { %v1471_v9 = vadd.f32 %v1470_v38, %v3093_v8 }
 0x159   :  { %v1472_v34 = vadd.f32 %v1471_v9, %v3104_v61 }
 0x15b   :  { %v1473_v51 = vadd.f32 %v1472_v34, %v3117_v29  ;;  %v3150_v61 = vpop.f32.mrf.mxu3 }
 0x15c   :  { %4349 = vst [vmem:[#allocation50_spill] sm:$0xff] %v3150_v61 }
 0x15d   :  { %v1474_v25 = vadd.f32 %v1473_v51, %v3128_v5  ;;  %v3154_v5 = vpop.f32.mrf.mxu2 }
 0x15f   :  { %v1475_v31 = vadd.f32 %v1474_v25, %v3139_v20 }
 0x161   :  { %v1476_v18 = vadd.f32 %v1475_v31, %v2955_v49 }
 0x163   :  { %v1477_v38 = vadd.f32 %v1476_v18, %v2964_v53  ;;  %v3158_v49 = vpop.f32.mrf.mxu3 }
 0x164   :  { %4350 = vst [vmem:[#allocation51_spill] sm:$0xff] %v3158_v49 }
 0x165   :  { %v1478_v8 = vadd.f32 %v1477_v38, %v2973_v57 }
 0x167   :  { %v1479_v9 = vadd.f32 %v1478_v8, %v2987_v63  ;;  %v3163_v63 = vpop.f32.mrf.mxu2 }
 0x168   :  { %4351 = vst [vmem:[#allocation52_spill] sm:$0xff] %v3163_v63 }
 0x169   :  { %v1480_v34 = vadd.f32 %v1479_v9, %v2996_v3 }
 0x16b   :  { %v1481_v51 = vadd.f32 %v1480_v34, %v3002_v6  ;;  %v3166_v3 = vpop.f32.mrf.mxu3 }
 0x16c   :  { %4352 = vst [vmem:[#allocation53_spill] sm:$0xff] %v3166_v3 }
 0x16d   :  { %v1482_v25 = vadd.f32 %v1481_v51, %v3011_v10 }
 0x16f   :  { %v1483_v31 = vadd.f32 %v1482_v25, %v3021_v15  ;;  %v3172_v10 = vpop.f32.mrf.mxu2 }
 0x170   :  { %4353 = vst [vmem:[#allocation54_spill] sm:$0xff] %v3172_v10 }
 0x171   :  { %v1484_v18 = vadd.f32 %v1483_v31, %v3034_v23 }
 0x173   :  { %v1485_v38 = vadd.f32 %v1484_v18, %v3042_v27  ;;  %v3174_v31 = vpop.f32.mrf.mxu3 }
 0x174   :  { %4354 = vst [vmem:[#allocation55_spill] sm:$0xff] %v3174_v31 }
 0x175   :  { %v1486_v8 = vadd.f32 %v1485_v38, %v3056_v37 }
 0x177   :  { %v1487_v9 = vadd.f32 %v1486_v8, %v3071_v2 }
 0x179   :  { %v1488_v34 = vadd.f32 %v1487_v9, %v3084_v36 }
 0x17b   :  { %v1489_v51 = vadd.f32 %v1488_v34, %v3099_v30  ;;  %v3180_v37 = vpop.f32.mrf.mxu3  ;;  %v3183_v34 = vpop.f32.mrf.mxu2 }
 0x17c   :  { %4355 = vst [vmem:[#allocation56_spill] sm:$0xff] %v3180_v37 }
 0x17d   :  { %v1490_v25 = vadd.f32 %v1489_v51, %v3110_v59 }
 0x17f   :  { %v1491_v15 = vadd.f32 %v1490_v25, %v3121_v46 }
 0x181   :  { %v1492_v18 = vadd.f32 %v1491_v15, %v3132_v0 }
 0x183   :  { %v1493_v38 = vadd.f32 %v1492_v18, %v3145_v28  ;;  %v783_v59 = vpop.f32.mrf.mxu3 }
 0x185   :  { %v1494_v8 = vadd.f32 %v1493_v38, %v3154_v5 }
 0x187   :  { %v1495_v2 = vadd.f32 %v1494_v8, %v3163_v63 }
 0x189   :  { %v1496_v9 = vadd.f32 %v1495_v2, %v3172_v10 }
 0x18b   :  { %v1497_v51 = vadd.f32 %v1496_v9, %v3183_v34 }
 0x18d   :  { %v1498_v25 = vadd.f32 %v1497_v51, %v3015_v12 }
 0x18f   :  { %v1499_v46 = vadd.f32 %v1498_v25, %v3023_v16 }
 0x191   :  { %v1500_v15 = vadd.f32 %v1499_v46, %v3032_v22 }
 0x193   :  { %v1501_v18 = vadd.f32 %v1500_v15, %v3040_v26 }
 0x195   :  { %v1502_v38 = vadd.f32 %v1501_v18, %v3052_v33 }
 0x197   :  { %v1503_v8 = vadd.f32 %v1502_v38, %v3062_v45 }
 0x199   :  { %v1504_v63 = vadd.f32 %v1503_v8, %v3074_v17 }
 0x19b   :  { %v1505_v2 = vadd.f32 %v1504_v63, %v3086_v39 }
 0x19d   :  { %v1506_v10 = vadd.f32 %v1505_v2, %v3096_v19 }
 0x19f   :  { %v1507_v9 = vadd.f32 %v1506_v10, %v3106_v47 }
 0x1a1   :  { %v1508_v51 = vadd.f32 %v1507_v9, %v3114_v42 }
 0x1a3   :  { %v1509_v59 = vadd.f32 %v1508_v51, %v3124_v44 }
 0x1a5   :  { %v1510_v46 = vadd.f32 %v1509_v59, %v3134_v24 }
 0x1a7   :  { %v1511_v25 = vadd.f32 %v1510_v46, %v3142_v54 }
 0x1a9   :  { %v1512_v15 = vadd.f32 %v1511_v25, %v3150_v61 }
 0x1ab   :  { %v1513_v18 = vadd.f32 %v1512_v15, %v3158_v49 }
 0x1ad   :  { %v1514_v38 = vadd.f32 %v1513_v18, %v3166_v3 }
 0x1af   :  { %v1515_v63 = vadd.f32 %v1514_v38, %v3174_v31 }
 0x1b1   :  { %v1516_v8 = vadd.f32 %v1515_v63, %v3180_v37 }
 0x1b3   :  { %v1517_v2 = vrot.slane %v1516_v8, 4 }
 0x1b5   :  { %v1518_v10 = vadd.f32 %v1517_v2, %v1516_v8 }
 0x1b7   :  { %v1519_v47 = vrot.slane %v1518_v10, 2 }
 0x1b9   :  { %v1520_v9 = vadd.f32 %v1519_v47, %v1518_v10 }
 0x1bb   :  { %v1521_v42 = vrot.slane %v1520_v9, 1 }
 0x1bd   :  { %v1522_v51 = vadd.f32 %v1521_v42, %v1520_v9 }
 0x1bf   :  { %v3205_v44 = vmul.f32 0.0015432099, %v1522_v51 }
 0x1c1   :  { %v1524_v59 = vsub.f32 %v2920_v35, %v3205_v44  ;;  %v1525_v46 = vsub.f32 %v2933_v40, %v3205_v44  ;;  %v1526_v25 = vsub.f32 %v2940_v43, %v3205_v44  ;;  %v1527_v38 = vsub.f32 %v2953_v48, %v3205_v44 }
 0x1c2   :  { %v1528_v47 = vsub.f32 %v2957_v50, %v3205_v44  ;;  %v1529_v8 = vsub.f32 %v2969_v55, %v3205_v44  ;;  %v1530_v9 = vsub.f32 %v2975_v58, %v3205_v44  ;;  %v1532_v50 = vsub.f32 %v2991_v1, %v3205_v44 }
 0x1c3   :  { %v1686_v15 = vmul.f32 %v1524_v59, %v1524_v59  ;;  %v1687_v18 = vmul.f32 %v1525_v46, %v1525_v46  ;;  %v1688_v42 = vmul.f32 %v1526_v25, %v1526_v25  ;;  %v1689_v2 = vmul.f32 %v1527_v38, %v1527_v38 }
 0x1c4   :  { %v1690_v51 = vmul.f32 %v1528_v47, %v1528_v47  ;;  %v1531_v59 = vsub.f32 %v2985_v62, %v3205_v44  ;;  %v1691_v46 = vmul.f32 %v1529_v8, %v1529_v8  ;;  %v1692_v25 = vmul.f32 %v1530_v9, %v1530_v9 }
 0x1c5   :  { %v1767_v63 = vadd.f32 %v1687_v18, %v1686_v15  ;;  %v1533_v18 = vsub.f32 %v2998_v4, %v3205_v44  ;;  %v1694_v47 = vmul.f32 %v1532_v50, %v1532_v50 }
 0x1c6   :  { %v1693_v38 = vmul.f32 %v1531_v59, %v1531_v59 }
 0x1c7   :  { %v1768_v10 = vadd.f32 %v1767_v63, %v1688_v42  ;;  %v1534_v63 = vsub.f32 %v3004_v7, %v3205_v44  ;;  %v1695_v8 = vmul.f32 %v1533_v18, %v1533_v18 }
 0x1c9   :  { %v1769_v43 = vadd.f32 %v1768_v10, %v1689_v2  ;;  %v1535_v10 = vsub.f32 %v3013_v11, %v3205_v44  ;;  %v1696_v9 = vmul.f32 %v1534_v63, %v1534_v63 }
 0x1cb   :  { %v1770_v48 = vadd.f32 %v1769_v43, %v1690_v51  ;;  %v1536_v51 = vsub.f32 %v3019_v14, %v3205_v44  ;;  %v1697_v59 = vmul.f32 %v1535_v10, %v1535_v10 }
 0x1cd   :  { %v1771_v15 = vadd.f32 %v1770_v48, %v1691_v46  ;;  %v1537_v46 = vsub.f32 %v3030_v21, %v3205_v44  ;;  %v1698_v50 = vmul.f32 %v1536_v51, %v1536_v51 }
 0x1cf   :  { %v1772_v42 = vadd.f32 %v1771_v15, %v1692_v25  ;;  %v4356_v15 = vld [vmem:[#allocation24_spill] sm:$0xff]  ;;  %v1699_v18 = vmul.f32 %v1537_v46, %v1537_v46 }
 0x1d0   :  { %v1538_v7 = vsub.f32 %v4356_v15, %v3205_v44 }
 0x1d1   :  { %v1773_v2 = vadd.f32 %v1772_v42, %v1693_v38  ;;  %v4357_v42 = vld [vmem:[#allocation26_spill] sm:$0xff] }
 0x1d2   :  { %v1539_v11 = vsub.f32 %v4357_v42, %v3205_v44  ;;  %v1700_v63 = vmul.f32 %v1538_v7, %v1538_v7 }
 0x1d3   :  { %v1774_v43 = vadd.f32 %v1773_v2, %v1694_v47  ;;  %v4358_v2 = vld [vmem:[#allocation29_spill] sm:$0xff] }
 0x1d4   :  { %v1540_v14 = vsub.f32 %v4358_v2, %v3205_v44  ;;  %v1701_v10 = vmul.f32 %v1539_v11, %v1539_v11 }
 0x1d5   :  { %v1775_v48 = vadd.f32 %v1774_v43, %v1695_v8  ;;  %v4359_v43 = vld [vmem:[#allocation31_spill] sm:$0xff] }
 0x1d6   :  { %v1541_v21 = vsub.f32 %v4359_v43, %v3205_v44  ;;  %v1702_v51 = vmul.f32 %v1540_v14, %v1540_v14 }
 0x1d7   :  { %v1776_v25 = vadd.f32 %v1775_v48, %v1696_v9  ;;  %v4360_v48 = vld [vmem:[#allocation35_spill] sm:$0xff] }
 0x1d8   :  { %v1542_v15 = vsub.f32 %v4360_v48, %v3205_v44  ;;  %v1703_v46 = vmul.f32 %v1541_v21, %v1541_v21 }
 0x1d9   :  { %v1777_v38 = vadd.f32 %v1776_v25, %v1697_v59  ;;  %v4361_v25 = vld [vmem:[#allocation37_spill] sm:$0xff] }
 0x1da   :  { %v1543_v42 = vsub.f32 %v4361_v25, %v3205_v44  ;;  %v1704_v7 = vmul.f32 %v1542_v15, %v1542_v15 }
 0x1db   :  { %v1778_v47 = vadd.f32 %v1777_v38, %v1698_v50  ;;  %v4362_v38 = vld [vmem:[#allocation3_spill] sm:$0xff] }
 0x1dc   :  { %v1544_v2 = vsub.f32 %v4362_v38, %v3205_v44  ;;  %v1705_v11 = vmul.f32 %v1543_v42, %v1543_v42 }
 0x1dd   :  { %v1779_v8 = vadd.f32 %v1778_v47, %v1699_v18  ;;  %v1545_v47 = vsub.f32 %v2935_v41, %v3205_v44 }
 0x1de   :  { %v1706_v14 = vmul.f32 %v1544_v2, %v1544_v2 }
 0x1df   :  { %v1780_v9 = vadd.f32 %v1779_v8, %v1700_v63  ;;  %v4363_v8 = vld [vmem:[#allocation5_spill] sm:$0xff]  ;;  %v1707_v21 = vmul.f32 %v1545_v47, %v1545_v47 }
 0x1e0   :  { %v1546_v48 = vsub.f32 %v4363_v8, %v3205_v44 }
 0x1e1   :  { %v1781_v59 = vadd.f32 %v1780_v9, %v1701_v10  ;;  %v4364_v9 = vld [vmem:[#allocation9_spill] sm:$0xff] }
 0x1e2   :  { %v1547_v25 = vsub.f32 %v4364_v9, %v3205_v44  ;;  %v1708_v15 = vmul.f32 %v1546_v48, %v1546_v48 }
 0x1e3   :  { %v1782_v50 = vadd.f32 %v1781_v59, %v1702_v51  ;;  %v1548_v59 = vsub.f32 %v2971_v56, %v3205_v44 }
 0x1e4   :  { %v1709_v42 = vmul.f32 %v1547_v25, %v1547_v25 }
 0x1e5   :  { %v1783_v18 = vadd.f32 %v1782_v50, %v1703_v46  ;;  %v1549_v50 = vsub.f32 %v2980_v60, %v3205_v44  ;;  %v1710_v2 = vmul.f32 %v1548_v59, %v1548_v59 }
 0x1e7   :  { %v1784_v63 = vadd.f32 %v1783_v18, %v1704_v7  ;;  %v4365_v18 = vld [vmem:[#allocation13_spill] sm:$0xff]  ;;  %v1711_v47 = vmul.f32 %v1549_v50, %v1549_v50 }
 0x1e8   :  { %v1550_v8 = vsub.f32 %v4365_v18, %v3205_v44 }
 0x1e9   :  { %v1785_v10 = vadd.f32 %v1784_v63, %v1705_v11  ;;  %v4366_v63 = vld [vmem:[#allocation15_spill] sm:$0xff] }
 0x1ea   :  { %v1551_v9 = vsub.f32 %v4366_v63, %v3205_v44  ;;  %v1712_v48 = vmul.f32 %v1550_v8, %v1550_v8 }
 0x1eb   :  { %v1786_v51 = vadd.f32 %v1785_v10, %v1706_v14  ;;  %v4367_v10 = vld [vmem:[#allocation17_spill] sm:$0xff] }
 0x1ec   :  { %v1552_v56 = vsub.f32 %v4367_v10, %v3205_v44  ;;  %v1713_v25 = vmul.f32 %v1551_v9, %v1551_v9 }
 0x1ed   :  { %v1787_v46 = vadd.f32 %v1786_v51, %v1707_v21  ;;  %v1553_v51 = vsub.f32 %v3017_v13, %v3205_v44 }
 0x1ee   :  { %v1714_v59 = vmul.f32 %v1552_v56, %v1552_v56 }
 0x1ef   :  { %v1788_v7 = vadd.f32 %v1787_v46, %v1708_v15  ;;  %v4368_v46 = vld [vmem:[#allocation22_spill] sm:$0xff]  ;;  %v1715_v50 = vmul.f32 %v1553_v51, %v1553_v51 }
 0x1f0   :  { %v1554_v18 = vsub.f32 %v4368_v46, %v3205_v44 }
 0x1f1   :  { %v1789_v11 = vadd.f32 %v1788_v7, %v1709_v42  ;;  %v4369_v7 = vld [vmem:[#allocation25_spill] sm:$0xff] }
 0x1f2   :  { %v1555_v63 = vsub.f32 %v4369_v7, %v3205_v44  ;;  %v1716_v8 = vmul.f32 %v1554_v18, %v1554_v18 }
 0x1f3   :  { %v1790_v14 = vadd.f32 %v1789_v11, %v1710_v2  ;;  %v1556_v11 = vsub.f32 %v3050_v32, %v3205_v44 }
 0x1f4   :  { %v1717_v9 = vmul.f32 %v1555_v63, %v1555_v63 }
 0x1f5   :  { %v1791_v21 = vadd.f32 %v1790_v14, %v1711_v47  ;;  %v1557_v14 = vsub.f32 %v3065_v52, %v3205_v44  ;;  %v1718_v56 = vmul.f32 %v1556_v11, %v1556_v11 }
 0x1f7   :  { %v1792_v15 = vadd.f32 %v1791_v21, %v1712_v48  ;;  %v4370_v21 = vld [vmem:[#allocation34_spill] sm:$0xff]  ;;  %v1719_v51 = vmul.f32 %v1557_v14, %v1557_v14 }
 0x1f8   :  { %v1558_v46 = vsub.f32 %v4370_v21, %v3205_v44 }
 0x1f9   :  { %v1793_v42 = vadd.f32 %v1792_v15, %v1713_v25  ;;  %v4371_v15 = vld [vmem:[#allocation38_spill] sm:$0xff] }
 0x1fa   :  { %v1559_v7 = vsub.f32 %v4371_v15, %v3205_v44  ;;  %v1720_v18 = vmul.f32 %v1558_v46, %v1558_v46 }
 0x1fb   :  { %v1794_v2 = vadd.f32 %v1793_v42, %v1714_v59  ;;  %v4372_v42 = vld [vmem:[#allocation39_spill] sm:$0xff] }
 0x1fc   :  { %v1560_v32 = vsub.f32 %v4372_v42, %v3205_v44  ;;  %v1721_v63 = vmul.f32 %v1559_v7, %v1559_v7 }
 0x1fd   :  { %v1795_v47 = vadd.f32 %v1794_v2, %v1715_v50  ;;  %v1561_v2 = vsub.f32 %v3117_v29, %v3205_v44 }
 0x1fe   :  { %v1722_v11 = vmul.f32 %v1560_v32, %v1560_v32 }
 0x1ff   :  { %v1796_v48 = vadd.f32 %v1795_v47, %v1716_v8  ;;  %v4373_v47 = vld [vmem:[#allocation45_spill] sm:$0xff]  ;;  %v1723_v14 = vmul.f32 %v1561_v2, %v1561_v2 }
 0x200   :  { %v1562_v21 = vsub.f32 %v4373_v47, %v3205_v44 }
 0x201   :  { %v1797_v25 = vadd.f32 %v1796_v48, %v1717_v9  ;;  %v1563_v48 = vsub.f32 %v3139_v20, %v3205_v44 }
 0x202   :  { %v1724_v46 = vmul.f32 %v1562_v21, %v1562_v21 }
 0x203   :  { %v1798_v59 = vadd.f32 %v1797_v25, %v1718_v56  ;;  %v4374_v25 = vld [vmem:[#allocation7_spill] sm:$0xff]  ;;  %v1725_v7 = vmul.f32 %v1563_v48, %v1563_v48 }
 0x204   :  { %v1564_v42 = vsub.f32 %v4374_v25, %v3205_v44 }
 0x205   :  { %v1799_v50 = vadd.f32 %v1798_v59, %v1719_v51  ;;  %v1565_v59 = vsub.f32 %v2964_v53, %v3205_v44 }
 0x206   :  { %v1726_v32 = vmul.f32 %v1564_v42, %v1564_v42 }
 0x207   :  { %v1800_v8 = vadd.f32 %v1799_v50, %v1720_v18  ;;  %v1566_v50 = vsub.f32 %v2973_v57, %v3205_v44  ;;  %v1727_v2 = vmul.f32 %v1565_v59, %v1565_v59 }
 0x209   :  { %v1801_v9 = vadd.f32 %v1800_v8, %v1721_v63  ;;  %v4375_v8 = vld [vmem:[#allocation12_spill] sm:$0xff]  ;;  %v1728_v21 = vmul.f32 %v1566_v50, %v1566_v50 }
 0x20a   :  { %v1567_v20 = vsub.f32 %v4375_v8, %v3205_v44 }
 0x20b   :  { %v1802_v56 = vadd.f32 %v1801_v9, %v1722_v11  ;;  %v4376_v9 = vld [vmem:[#allocation14_spill] sm:$0xff] }
 0x20c   :  { %v1568_v25 = vsub.f32 %v4376_v9, %v3205_v44  ;;  %v1729_v48 = vmul.f32 %v1567_v20, %v1567_v20 }
 0x20d   :  { %v1803_v51 = vadd.f32 %v1802_v56, %v1723_v14  ;;  %v1569_v56 = vsub.f32 %v3002_v6, %v3205_v44 }
 0x20e   :  { %v1730_v42 = vmul.f32 %v1568_v25, %v1568_v25 }
 0x20f   :  { %v1804_v18 = vadd.f32 %v1803_v51, %v1724_v46  ;;  %v4377_v51 = vld [vmem:[#allocation18_spill] sm:$0xff]  ;;  %v1731_v59 = vmul.f32 %v1569_v56, %v1569_v56 }
 0x210   :  { %v1570_v57 = vsub.f32 %v4377_v51, %v3205_v44 }
 0x211   :  { %v1805_v63 = vadd.f32 %v1804_v18, %v1725_v7  ;;  %v4378_v18 = vld [vmem:[#allocation21_spill] sm:$0xff] }
 0x212   :  { %v1571_v8 = vsub.f32 %v4378_v18, %v3205_v44  ;;  %v1732_v50 = vmul.f32 %v1570_v57, %v1570_v57 }
 0x213   :  { %v1806_v11 = vadd.f32 %v1805_v63, %v1726_v32  ;;  %v1572_v63 = vsub.f32 %v3034_v23, %v3205_v44 }
 0x214   :  { %v1733_v20 = vmul.f32 %v1571_v8, %v1571_v8 }
 0x215   :  { %v1807_v14 = vadd.f32 %v1806_v11, %v1727_v2  ;;  %v1573_v11 = vsub.f32 %v3042_v27, %v3205_v44  ;;  %v1734_v25 = vmul.f32 %v1572_v63, %v1572_v63 }
 0x217   :  { %v1808_v46 = vadd.f32 %v1807_v14, %v1728_v21  ;;  %v4379_v14 = vld [vmem:[#allocation28_spill] sm:$0xff]  ;;  %v1735_v56 = vmul.f32 %v1573_v11, %v1573_v11 }
 0x218   :  { %v1574_v51 = vsub.f32 %v4379_v14, %v3205_v44 }
 0x219   :  { %v1809_v7 = vadd.f32 %v1808_v46, %v1729_v48  ;;  %v4380_v46 = vld [vmem:[#allocation32_spill] sm:$0xff] }
 0x21a   :  { %v1575_v18 = vsub.f32 %v4380_v46, %v3205_v44  ;;  %v1736_v57 = vmul.f32 %v1574_v51, %v1574_v51 }
 0x21b   :  { %v1810_v32 = vadd.f32 %v1809_v7, %v1730_v42  ;;  %v1576_v7 = vsub.f32 %v3084_v36, %v3205_v44 }
 0x21c   :  { %v1737_v8 = vmul.f32 %v1575_v18, %v1575_v18 }
 0x21d   :  { %v1811_v2 = vadd.f32 %v1810_v32, %v1731_v59  ;;  %v1577_v32 = vsub.f32 %v3099_v30, %v3205_v44  ;;  %v1738_v63 = vmul.f32 %v1576_v7, %v1576_v7 }
 0x21f   :  { %v1812_v21 = vadd.f32 %v1811_v2, %v1732_v50  ;;  %v4381_v2 = vld [vmem:[#allocation41_spill] sm:$0xff]  ;;  %v1739_v11 = vmul.f32 %v1577_v32, %v1577_v32 }
 0x220   :  { %v1578_v14 = vsub.f32 %v4381_v2, %v3205_v44 }
 0x221   :  { %v1813_v48 = vadd.f32 %v1812_v21, %v1733_v20  ;;  %v4382_v21 = vld [vmem:[#allocation43_spill] sm:$0xff] }
 0x222   :  { %v1579_v46 = vsub.f32 %v4382_v21, %v3205_v44  ;;  %v1740_v51 = vmul.f32 %v1578_v14, %v1578_v14 }
 0x223   :  { %v1814_v42 = vadd.f32 %v1813_v48, %v1734_v25  ;;  %v1580_v48 = vsub.f32 %v3132_v0, %v3205_v44 }
 0x224   :  { %v1741_v18 = vmul.f32 %v1579_v46, %v1579_v46 }
 0x225   :  { %v1815_v59 = vadd.f32 %v1814_v42, %v1735_v56  ;;  %v1581_v42 = vsub.f32 %v3145_v28, %v3205_v44  ;;  %v1742_v7 = vmul.f32 %v1580_v48, %v1580_v48 }
 0x227   :  { %v1816_v50 = vadd.f32 %v1815_v59, %v1736_v57  ;;  %v1582_v59 = vsub.f32 %v3154_v5, %v3205_v44  ;;  %v1743_v32 = vmul.f32 %v1581_v42, %v1581_v42 }
 0x229   :  { %v1817_v20 = vadd.f32 %v1816_v50, %v1737_v8  ;;  %v4383_v50 = vld [vmem:[#allocation52_spill] sm:$0xff]  ;;  %v1744_v14 = vmul.f32 %v1582_v59, %v1582_v59 }
 0x22a   :  { %v1583_v21 = vsub.f32 %v4383_v50, %v3205_v44 }
 0x22b   :  { %v1818_v25 = vadd.f32 %v1817_v20, %v1738_v63  ;;  %v4384_v20 = vld [vmem:[#allocation54_spill] sm:$0xff] }
 0x22c   :  { %v1584_v0 = vsub.f32 %v4384_v20, %v3205_v44  ;;  %v1745_v46 = vmul.f32 %v1583_v21, %v1583_v21 }
 0x22d   :  { %v1819_v56 = vadd.f32 %v1818_v25, %v1739_v11  ;;  %v1585_v25 = vsub.f32 %v3183_v34, %v3205_v44 }
 0x22e   :  { %v1746_v48 = vmul.f32 %v1584_v0, %v1584_v0 }
 0x22f   :  { %v1820_v57 = vadd.f32 %v1819_v56, %v1740_v51  ;;  %v1586_v56 = vsub.f32 %v3015_v12, %v3205_v44  ;;  %v1747_v42 = vmul.f32 %v1585_v25, %v1585_v25 }
 0x231   :  { %v1821_v8 = vadd.f32 %v1820_v57, %v1741_v18  ;;  %v1587_v57 = vsub.f32 %v3023_v16, %v3205_v44  ;;  %v1748_v59 = vmul.f32 %v1586_v56, %v1586_v56 }
 0x233   :  { %v1822_v63 = vadd.f32 %v1821_v8, %v1742_v7  ;;  %v1588_v8 = vsub.f32 %v3032_v22, %v3205_v44  ;;  %v1749_v21 = vmul.f32 %v1587_v57, %v1587_v57 }
 0x235   :  { %v1823_v11 = vadd.f32 %v1822_v63, %v1743_v32  ;;  %v1589_v63 = vsub.f32 %v3040_v26, %v3205_v44  ;;  %v1750_v0 = vmul.f32 %v1588_v8, %v1588_v8 }
 0x237   :  { %v1824_v51 = vadd.f32 %v1823_v11, %v1744_v14  ;;  %v1590_v11 = vsub.f32 %v3052_v33, %v3205_v44  ;;  %v1751_v25 = vmul.f32 %v1589_v63, %v1589_v63 }
 0x239   :  { %v1825_v18 = vadd.f32 %v1824_v51, %v1745_v46  ;;  %v1591_v51 = vsub.f32 %v3062_v45, %v3205_v44  ;;  %v1752_v56 = vmul.f32 %v1590_v11, %v1590_v11 }
 0x23b   :  { %v1826_v7 = vadd.f32 %v1825_v18, %v1746_v48  ;;  %v1592_v18 = vsub.f32 %v3074_v17, %v3205_v44  ;;  %v1753_v57 = vmul.f32 %v1591_v51, %v1591_v51 }
 0x23d   :  { %v1827_v32 = vadd.f32 %v1826_v7, %v1747_v42  ;;  %v1593_v7 = vsub.f32 %v3086_v39, %v3205_v44  ;;  %v1754_v8 = vmul.f32 %v1592_v18, %v1592_v18 }
 0x23f   :  { %v1828_v14 = vadd.f32 %v1827_v32, %v1748_v59  ;;  %v1594_v32 = vsub.f32 %v3096_v19, %v3205_v44  ;;  %v1755_v63 = vmul.f32 %v1593_v7, %v1593_v7 }
 0x241   :  { %v1829_v46 = vadd.f32 %v1828_v14, %v1749_v21  ;;  %v4385_v14 = vld [vmem:[#allocation40_spill] sm:$0xff]  ;;  %v1756_v11 = vmul.f32 %v1594_v32, %v1594_v32 }
 0x242   :  { %v1595_v45 = vsub.f32 %v4385_v14, %v3205_v44 }
 0x243   :  { %v1830_v48 = vadd.f32 %v1829_v46, %v1750_v0  ;;  %v4386_v46 = vld [vmem:[#allocation42_spill] sm:$0xff] }
 0x244   :  { %v1596_v17 = vsub.f32 %v4386_v46, %v3205_v44  ;;  %v1757_v51 = vmul.f32 %v1595_v45, %v1595_v45 }
 0x245   :  { %v1831_v42 = vadd.f32 %v1830_v48, %v1751_v25  ;;  %v4387_v48 = vld [vmem:[#allocation44_spill] sm:$0xff] }
 0x246   :  { %v1597_v39 = vsub.f32 %v4387_v48, %v3205_v44  ;;  %v1758_v18 = vmul.f32 %v1596_v17, %v1596_v17 }
 0x247   :  { %v1832_v59 = vadd.f32 %v1831_v42, %v1752_v56  ;;  %v1598_v42 = vsub.f32 %v3134_v24, %v3205_v44 }
 0x248   :  { %v1759_v7 = vmul.f32 %v1597_v39, %v1597_v39 }
 0x249   :  { %v1833_v21 = vadd.f32 %v1832_v59, %v1753_v57  ;;  %v1599_v59 = vsub.f32 %v3142_v54, %v3205_v44  ;;  %v1760_v32 = vmul.f32 %v1598_v42, %v1598_v42 }
 0x24b   :  { %v1834_v0 = vadd.f32 %v1833_v21, %v1754_v8  ;;  %v1600_v21 = vsub.f32 %v3150_v61, %v3205_v44  ;;  %v1761_v45 = vmul.f32 %v1599_v59, %v1599_v59 }
 0x24d   :  { %v1835_v25 = vadd.f32 %v1834_v0, %v1755_v63  ;;  %v1601_v0 = vsub.f32 %v3158_v49, %v3205_v44  ;;  %v1762_v17 = vmul.f32 %v1600_v21, %v1600_v21 }
 0x24f   :  { %v1836_v56 = vadd.f32 %v1835_v25, %v1756_v11  ;;  %v1602_v25 = vsub.f32 %v3166_v3, %v3205_v44  ;;  %v1763_v39 = vmul.f32 %v1601_v0, %v1601_v0 }
 0x251   :  { %v1837_v57 = vadd.f32 %v1836_v56, %v1757_v51  ;;  %v1603_v56 = vsub.f32 %v3174_v31, %v3205_v44  ;;  %v1764_v42 = vmul.f32 %v1602_v25, %v1602_v25 }
 0x253   :  { %v1838_v8 = vadd.f32 %v1837_v57, %v1758_v18  ;;  %v1604_v57 = vsub.f32 %v3180_v37, %v3205_v44 }
 0x255   :  { %v1839_v63 = vadd.f32 %v1838_v8, %v1759_v7  ;;  %v1765_v8 = vmul.f32 %v1603_v56, %v1603_v56  ;;  %v1766_v49 = vmul.f32 %v1604_v57, %v1604_v57  ;;  %v3380_v56 = vld [vmem:[%s4214_s3] sm:$0x1] }
 0x257   :  { %v1840_v11 = vadd.f32 %v1839_v63, %v1760_v32 }
 0x259   :  { %v1841_v51 = vadd.f32 %v1840_v11, %v1761_v45 }
 0x25b   :  { %v1842_v18 = vadd.f32 %v1841_v51, %v1762_v17 }
 0x25d   :  { %v1843_v7 = vadd.f32 %v1842_v18, %v1763_v39 }
 0x25f   :  { %v1844_v61 = vadd.f32 %v1843_v7, %v1764_v42  ;;  %v4389_v42 = vld [vmem:[#allocation6_spill] sm:$0xff] }
 0x261   :  { %v1845_v59 = vadd.f32 %v1844_v61, %v1765_v8  ;;  %v4390_v8 = vld [vmem:[#allocation8_spill] sm:$0xff] }
 0x263   :  { %v1846_v32 = vadd.f32 %v1845_v59, %v1766_v49  ;;  %v1865_v49 = vld [vmem:[%s4213_s2] sm:$0x1] }
 0x265   :  { %v1847_v63 = vrot.slane %v1846_v32, 4 }
 0x267   :  { %v1848_v54 = vadd.f32 %v1847_v63, %v1846_v32 }
 0x269   :  { %v1849_v3 = vrot.slane %v1848_v54, 2 }
 0x26b   :  { %v1850_v21 = vadd.f32 %v1849_v3, %v1848_v54 }
 0x26d   :  { %v1851_v45 = vrot.slane %v1850_v21, 1 }
 0x26f   :  { %v1852_v11 = vadd.f32 %v1851_v45, %v1850_v21  ;;  %v4391_v45 = vld [vmem:[#allocation16_spill] sm:$0xff] }
 0x271   :  { %v1853_v24 = vmul.f32 0.0015432099, %v1852_v11  ;;  %v4392_v11 = vld [vmem:[#allocation19_spill] sm:$0xff] }
 0x273   :  { %v1854_v31 = vadd.f32 1e-05, %v1853_v24 }
 0x275   :  { %2788 = vrsqrt.f32 %v1854_v31  ;;  %vm1861_vm1 = vweird.f32 %v1854_v31 }
 0x27b   :  { %v2789_v0 = vpop.eup %2788 }
 0x27c   :  { %v1856_v17 = vmul.f32 %v2789_v0, %v1854_v31  ;;  %vm1862_vm0 = vweird.f32 %v2789_v0 }
 0x27d   :  { %vm1863_vm2 = vmor %vm1861_vm1, %vm1862_vm0 }
 0x27e   :  { %v1857_v51 = vmul.f32 %v2789_v0, %v1856_v17  ;;  %v4394_v17 = vld [vmem:[#allocation23_spill] sm:$0xff] }
 0x280   :  { %v1858_v37 = vmul.f32 0.5, %v1857_v51  ;;  %v4395_v51 = vld [vmem:[#allocation24_spill] sm:$0xff] }
 0x282   :  { %v1859_v25 = vsub.f32 1.5, %v1858_v37  ;;  %v4407_v37 = vld [vmem:[#allocation15_spill] sm:$0xff] }
 0x284   :  { %v1860_v39 = vmul.f32 %v2789_v0, %v1859_v25  ;;  %v4396_v25 = vld [vmem:[#allocation26_spill] sm:$0xff] }
 0x286   :  { %v1864_v61 = vsel %vm1863_vm2, %v2789_v0, %v1860_v39  ;;  %v4393_v0 = vld [vmem:[#allocation20_spill] sm:$0xff] }
 0x287   :  { %v1866_v3 = vmul.f32 %v1865_v49, %v1864_v61  ;;  %v4397_v61 = vld [vmem:[#allocation29_spill] sm:$0xff] }
 0x289   :  { %v3373_v54 = vmul.f32 %v1866_v3, %v3205_v44  ;;  %v3375_v24 = vperm.slane %v1866_v3, 0  ;;  %v4388_v44 = vld [vmem:[#allocation4_spill] sm:$0xff] }
 0x28b   :  { %v3386_v31 = vmul.f32 %v3375_v24, %v2920_v35  ;;  %v3390_v18 = vmul.f32 %v3375_v24, %v2933_v40  ;;  %v3394_v57 = vmul.f32 %v3375_v24, %v4388_v44  ;;  %v3398_v7 = vmul.f32 %v3375_v24, %v4389_v42  ;;  %v4398_v44 = vld [vmem:[#allocation35_spill] sm:$0xff] }
 0x28c   :  { %v3402_v59 = vmul.f32 %v3375_v24, %v4390_v8  ;;  %v3406_v35 = vmul.f32 %v3375_v24, %v2969_v55  ;;  %v3410_v40 = vmul.f32 %v3375_v24, %v2975_v58  ;;  %v3414_v32 = vmul.f32 %v3375_v24, %v2985_v62  ;;  %v4399_v8 = vld [vmem:[#allocation37_spill] sm:$0xff] }
 0x28d   :  { %v3418_v63 = vmul.f32 %v3375_v24, %v2991_v1  ;;  %v3422_v21 = vmul.f32 %v3375_v24, %v2998_v4  ;;  %v3426_v55 = vmul.f32 %v3375_v24, %v4391_v45  ;;  %v3430_v58 = vmul.f32 %v3375_v24, %v4392_v11 }
 0x28e   :  { %v3434_v62 = vmul.f32 %v3375_v24, %v4393_v0  ;;  %v3438_v1 = vmul.f32 %v3375_v24, %v4394_v17  ;;  %v3442_v4 = vmul.f32 %v3375_v24, %v4395_v51  ;;  %v3446_v39 = vmul.f32 %v3375_v24, %v4396_v25  ;;  %v4400_v17 = vld [vmem:[#allocation5_spill] sm:$0xff] }
 0x28f   :  { %v3450_v49 = vmul.f32 %v3375_v24, %v4397_v61  ;;  %v3454_v3 = vmul.f32 %v3375_v24, %v4359_v43  ;;  %v3458_v42 = vmul.f32 %v3375_v24, %v4398_v44  ;;  %v3462_v45 = vmul.f32 %v3375_v24, %v4399_v8  ;;  %v4401_v51 = vld [vmem:[#allocation9_spill] sm:$0xff]  ;;  %v4402_v61 = vld [vmem:[#allocation10_spill] sm:$0xff] }
 0x290   :  { %v3466_v11 = vmul.f32 %v3375_v24, %v4362_v38  ;;  %v3470_v0 = vmul.f32 %v3375_v24, %v2935_v41  ;;  %v3474_v43 = vmul.f32 %v3375_v24, %v4400_v17  ;;  %v3478_v25 = vmul.f32 %v3375_v24, %v4401_v51  ;;  %v4405_v8 = vld [vmem:[#allocation13_spill] sm:$0xff] }
 0x291   :  { %v3482_v44 = vmul.f32 %v3375_v24, %v4402_v61  ;;  %v3486_v38 = vmul.f32 %v3375_v24, %v2980_v60  ;;  %v3490_v41 = vmul.f32 %v3375_v24, %v4405_v8  ;;  %v3494_v17 = vmul.f32 %v3375_v24, %v4407_v37 }
 0x292   :  { %v3498_v51 = vmul.f32 %v3375_v24, %v4367_v10  ;;  %v3502_v61 = vmul.f32 %v3375_v24, %v3017_v13  ;;  %v3518_v10 = vmul.f32 %v3375_v24, %v3065_v52  ;;  %v3538_v52 = vmul.f32 %v3375_v24, %v4373_v47 }
 0x293   :  { %4403 = vst [vmem:[#allocation31_spill] sm:$0xff] %v3482_v44  ;;  %v4409_v44 = vld [vmem:[#allocation22_spill] sm:$0xff] }
 0x294   :  { %4404 = vst [vmem:[#allocation3_spill] sm:$0xff] %v3486_v38  ;;  %v3506_v60 = vmul.f32 %v3375_v24, %v4409_v44  ;;  %v4411_v38 = vld [vmem:[#allocation25_spill] sm:$0xff]  ;;  %v3526_v44 = vmul.f32 %v3375_v24, %v4371_v15 }
 0x295   :  { %4406 = vst [vmem:[#allocation17_spill] sm:$0xff] %v3490_v41  ;;  %v3510_v8 = vmul.f32 %v3375_v24, %v4411_v38  ;;  %v4412_v41 = vld [vmem:[#allocation27_spill] sm:$0xff] }
 0x296   :  { %4408 = vst [vmem:[#allocation38_spill] sm:$0xff] %v3498_v51  ;;  %v3514_v37 = vmul.f32 %v3375_v24, %v4412_v41  ;;  %v4414_v51 = vld [vmem:[#allocation34_spill] sm:$0xff]  ;;  %v3534_v41 = vmul.f32 %v3375_v24, %v3117_v29 }
 0x297   :  { %4410 = vst [vmem:[#allocation45_spill] sm:$0xff] %v3506_v60  ;;  %v3522_v13 = vmul.f32 %v3375_v24, %v4414_v51  ;;  %v4416_v60 = vld [vmem:[#allocation39_spill] sm:$0xff] }
 0x298   :  { %4413 = vst [vmem:[#allocation14_spill] sm:$0xff] %v3518_v10  ;;  %v3530_v38 = vmul.f32 %v3375_v24, %v4416_v60  ;;  %v4419_v10 = vld [vmem:[#allocation48_spill] sm:$0xff]  ;;  %v3550_v60 = vmul.f32 %v3375_v24, %v2964_v53 }
 0x299   :  { %4415 = vst [vmem:[#allocation41_spill] sm:$0xff] %v3522_v13  ;;  %v3542_v51 = vmul.f32 %v3375_v24, %v4419_v10  ;;  %v4420_v13 = vld [vmem:[#allocation7_spill] sm:$0xff]  ;;  %v3562_v10 = vmul.f32 %v3375_v24, %v4376_v9  ;;  %v3582_v9 = vmul.f32 %v3375_v24, %v3042_v27  ;;  %v3602_v27 = vmul.f32 %v3375_v24, %v4381_v2 }
 0x29a   :  { %4417 = vst [vmem:[#allocation52_spill] sm:$0xff] %v3530_v38  ;;  %v3546_v15 = vmul.f32 %v3375_v24, %v4420_v13  ;;  %v4423_v38 = vld [vmem:[#allocation11_spill] sm:$0xff]  ;;  %v3566_v13 = vmul.f32 %v3375_v24, %v3002_v6  ;;  %v3622_v2 = vmul.f32 %v3375_v24, %v4383_v50  ;;  %v3642_v50 = vmul.f32 %v3375_v24, %v3032_v22 }
 0x29b   :  { %4418 = vst [vmem:[#allocation54_spill] sm:$0xff] %v3534_v41  ;;  %v3554_v29 = vmul.f32 %v3375_v24, %v4423_v38  ;;  %v4424_v41 = vld [vmem:[#allocation12_spill] sm:$0xff]  ;;  %v4445_v22 = vsub.f32 %v3380_v56, %v3373_v54  ;;  %v3683_v54 = vmul.f32 %v3375_v24, %v4387_v48  ;;  %v4452_v56 = vld [vmem:[#allocation47_spill] sm:$0xff] }
 0x29c   :  { %4421 = vst [vmem:[#allocation40_spill] sm:$0xff] %v3546_v15  ;;  %v3558_v47 = vmul.f32 %v3375_v24, %v4424_v41  ;;  %v4427_v15 = vld [vmem:[#allocation18_spill] sm:$0xff]  ;;  %v3578_v41 = vmul.f32 %v3375_v24, %v3034_v23  ;;  %v3598_v23 = vmul.f32 %v3375_v24, %v3099_v30  ;;  %v3618_v30 = vmul.f32 %v3375_v24, %v3154_v5 }
 0x29d   :  { %4422 = vst [vmem:[#allocation42_spill] sm:$0xff] %v3550_v60  ;;  %v3570_v53 = vmul.f32 %v3375_v24, %v4427_v15  ;;  %v4428_v60 = vld [vmem:[#allocation21_spill] sm:$0xff]  ;;  %v3638_v5 = vmul.f32 %v3375_v24, %v3023_v16 }
 0x29e   :  { %4425 = vst [vmem:[#allocation44_spill] sm:$0xff] %v3562_v10  ;;  %v3574_v38 = vmul.f32 %v3375_v24, %v4428_v60  ;;  %v4430_v10 = vld [vmem:[#allocation28_spill] sm:$0xff]  ;;  %v3594_v60 = vmul.f32 %v3375_v24, %v3084_v36  ;;  %v3614_v36 = vmul.f32 %v3375_v24, %v3145_v28  ;;  %v3634_v28 = vmul.f32 %v3375_v24, %v3015_v12 }
 0x29f   :  { %4426 = vst [vmem:[#allocation4_spill] sm:$0xff] %v3566_v13  ;;  %v3586_v6 = vmul.f32 %v3375_v24, %v4430_v10  ;;  %v4432_v13 = vld [vmem:[#allocation32_spill] sm:$0xff] }
 0x2a0   :  { %4429 = vst [vmem:[#allocation6_spill] sm:$0xff] %v3582_v9  ;;  %v3590_v15 = vmul.f32 %v3375_v24, %v4432_v13  ;;  %v4433_v9 = vld [vmem:[#allocation43_spill] sm:$0xff] }
 0x2a1   :  { %4431 = vst [vmem:[#allocation8_spill] sm:$0xff] %v3586_v6  ;;  %v3606_v10 = vmul.f32 %v3375_v24, %v4433_v9  ;;  %v4434_v6 = vld [vmem:[#allocation46_spill] sm:$0xff]  ;;  %v3626_v9 = vmul.f32 %v3375_v24, %v4384_v20  ;;  %v3646_v20 = vmul.f32 %v3375_v24, %v3040_v26 }
 0x2a2   :  { %v3610_v13 = vmul.f32 %v3375_v24, %v4434_v6  ;;  %v3630_v6 = vmul.f32 %v3375_v24, %v3183_v34  ;;  %4436 = vst [vmem:[#allocation19_spill] sm:$0xff] %v3634_v28  ;;  %v3650_v34 = vmul.f32 %v3375_v24, %v3052_v33  ;;  %v4443_v28 = vld [vmem:[#allocation33_spill] sm:$0xff]  ;;  %v3671_v33 = vmul.f32 %v3375_v24, %v3096_v19 }
 0x2a3   :  { %4437 = vst [vmem:[#allocation20_spill] sm:$0xff] %v3638_v5  ;;  %v3658_v16 = vmul.f32 %v3375_v24, %v4443_v28  ;;  %v4446_v5 = vld [vmem:[#allocation36_spill] sm:$0xff]  ;;  %v3679_v28 = vmul.f32 %v3375_v24, %v4386_v46 }
 0x2a4   :  { %4435 = vst [vmem:[#allocation16_spill] sm:$0xff] %v3630_v6  ;;  %v4441_v6 = vld [vmem:[#allocation30_spill] sm:$0xff]  ;;  %v3667_v26 = vmul.f32 %v3375_v24, %v4446_v5  ;;  %v3687_v5 = vmul.f32 %v3375_v24, %v4452_v56 }
 0x2a5   :  { %4438 = vst [vmem:[#allocation23_spill] sm:$0xff] %v3642_v50  ;;  %v3654_v12 = vmul.f32 %v3375_v24, %v4441_v6  ;;  %v3663_v50 = vperm.slane %v4445_v22, 0  ;;  %v3675_v6 = vmul.f32 %v3375_v24, %v4385_v14  ;;  %v4454_v22 = vld [vmem:[#allocation49_spill] sm:$0xff] }
 0x2a6   :  { %4439 = vst [vmem:[#allocation24_spill] sm:$0xff] %v3646_v20  ;;  %v3691_v19 = vmul.f32 %v3375_v24, %v4454_v22  ;;  %v4480_v20 = vld [vmem:[#allocation44_spill] sm:$0xff] }
 0x2a7   :  { %4440 = vst [vmem:[#allocation26_spill] sm:$0xff] %v3650_v34  ;;  %v4477_v34 = vld [vmem:[#allocation42_spill] sm:$0xff] }
 0x2a8   :  { %4442 = vst [vmem:[#allocation29_spill] sm:$0xff] %v3654_v12  ;;  %v4476_v12 = vld [vmem:[#allocation40_spill] sm:$0xff] }
 0x2a9   :  { %4444 = vst [vmem:[#allocation35_spill] sm:$0xff] %v3658_v16  ;;  %v4474_v16 = vld [vmem:[#allocation54_spill] sm:$0xff] }
 0x2aa   :  { %4447 = vst [vmem:[#allocation37_spill] sm:$0xff] %v3667_v26  ;;  %v4473_v26 = vld [vmem:[#allocation52_spill] sm:$0xff] }
 0x2ab   :  { %4448 = vst [vmem:[#allocation5_spill] sm:$0xff] %v3671_v33  ;;  %v4456_v33 = vld [vmem:[#allocation50_spill] sm:$0xff] }
 0x2ac   :  { %4449 = vst [vmem:[#allocation9_spill] sm:$0xff] %v3675_v6  ;;  %v3695_v14 = vmul.f32 %v3375_v24, %v4456_v33  ;;  %v4458_v6 = vld [vmem:[#allocation51_spill] sm:$0xff]  ;;  %v3715_v33 = vadd.f32 %v3663_v50, %v3386_v31  ;;  %v3735_v31 = vadd.f32 %v3663_v50, %v3406_v35  ;;  %v3755_v35 = vadd.f32 %v3663_v50, %v3426_v55 }
 0x2ad   :  { %4450 = vst [vmem:[#allocation10_spill] sm:$0xff] %v3679_v28  ;;  %v3699_v46 = vmul.f32 %v3375_v24, %v4458_v6  ;;  %v4460_v28 = vld [vmem:[#allocation53_spill] sm:$0xff]  ;;  %v3719_v6 = vadd.f32 %v3663_v50, %v3390_v18  ;;  %v3739_v18 = vadd.f32 %v3663_v50, %v3410_v40  ;;  %v3759_v40 = vadd.f32 %v3663_v50, %v3430_v58 }
 0x2ae   :  { %4451 = vst [vmem:[#allocation13_spill] sm:$0xff] %v3683_v54  ;;  %v3703_v48 = vmul.f32 %v3375_v24, %v4460_v28  ;;  %v4462_v54 = vld [vmem:[#allocation55_spill] sm:$0xff]  ;;  %v3723_v28 = vadd.f32 %v3663_v50, %v3394_v57  ;;  %v3743_v57 = vadd.f32 %v3663_v50, %v3414_v32  ;;  %v3763_v32 = vadd.f32 %v3663_v50, %v3434_v62 }
 0x2af   :  { %4453 = vst [vmem:[#allocation15_spill] sm:$0xff] %v3687_v5  ;;  %v3707_v56 = vmul.f32 %v3375_v24, %v4462_v54  ;;  %v4464_v5 = vld [vmem:[#allocation56_spill] sm:$0xff]  ;;  %v3727_v54 = vadd.f32 %v3663_v50, %v3398_v7  ;;  %v3747_v7 = vadd.f32 %v3663_v50, %v3418_v63  ;;  %v3767_v63 = vadd.f32 %v3663_v50, %v3438_v1 }
 0x2b0   :  { %4455 = vst [vmem:[#allocation22_spill] sm:$0xff] %v3691_v19  ;;  %v3711_v22 = vmul.f32 %v3375_v24, %v4464_v5  ;;  %v3731_v24 = vadd.f32 %v3663_v50, %v3402_v59  ;;  %v3751_v59 = vadd.f32 %v3663_v50, %v3422_v21  ;;  %v3771_v21 = vadd.f32 %v3663_v50, %v3442_v4  ;;  %v4466_v5 = vld [vmem:[#allocation31_spill] sm:$0xff]  ;;  %v4472_v19 = vld [vmem:[#allocation41_spill] sm:$0xff] }
 0x2b1   :  { %4457 = vst [vmem:[#allocation25_spill] sm:$0xff] %v3695_v14  ;;  %v3775_v55 = vadd.f32 %v3663_v50, %v3446_v39  ;;  %v3779_v58 = vadd.f32 %v3663_v50, %v3450_v49  ;;  %v3783_v62 = vadd.f32 %v3663_v50, %v3454_v3  ;;  %v3787_v1 = vadd.f32 %v3663_v50, %v3458_v42  ;;  %v4471_v14 = vld [vmem:[#allocation14_spill] sm:$0xff] }
 0x2b2   :  { %4459 = vst [vmem:[#allocation27_spill] sm:$0xff] %v3699_v46  ;;  %v3791_v4 = vadd.f32 %v3663_v50, %v3462_v45  ;;  %v3795_v39 = vadd.f32 %v3663_v50, %v3466_v11  ;;  %v3799_v49 = vadd.f32 %v3663_v50, %v3470_v0  ;;  %v3803_v3 = vadd.f32 %v3663_v50, %v3474_v43  ;;  %v4470_v46 = vld [vmem:[#allocation45_spill] sm:$0xff] }
 0x2b3   :  { %4461 = vst [vmem:[#allocation34_spill] sm:$0xff] %v3703_v48  ;;  %v3807_v42 = vadd.f32 %v3663_v50, %v3478_v25  ;;  %v3811_v45 = vadd.f32 %v3663_v50, %v4466_v5  ;;  %v3823_v43 = vadd.f32 %v3663_v50, %v3494_v17  ;;  %v4469_v48 = vld [vmem:[#allocation38_spill] sm:$0xff]  ;;  %v3831_v5 = vadd.f32 %v3663_v50, %v3502_v61 }
 0x2b4   :  { %4463 = vst [vmem:[#allocation39_spill] sm:$0xff] %v3707_v56  ;;  %v4468_v56 = vld [vmem:[#allocation17_spill] sm:$0xff]  ;;  %v3827_v25 = vadd.f32 %v3663_v50, %v4469_v48  ;;  %v3843_v17 = vadd.f32 %v3663_v50, %v3514_v37  ;;  %v3847_v48 = vadd.f32 %v3663_v50, %v4471_v14  ;;  %v3851_v61 = vadd.f32 %v3663_v50, %v4472_v19 }
 0x2b5   :  { %4465 = vst [vmem:[#allocation48_spill] sm:$0xff] %v3711_v22  ;;  %v4467_v22 = vld [vmem:[#allocation3_spill] sm:$0xff]  ;;  %v3819_v0 = vadd.f32 %v3663_v50, %v4468_v56  ;;  %v3839_v56 = vadd.f32 %v3663_v50, %v3510_v8  ;;  %v3859_v8 = vadd.f32 %v3663_v50, %v4473_v26  ;;  %v3863_v37 = vadd.f32 %v3663_v50, %v4474_v16 }
 0x2b6   :  { %v3815_v11 = vadd.f32 %v3663_v50, %v4467_v22  ;;  %v3835_v22 = vadd.f32 %v3663_v50, %v4470_v46  ;;  %v3855_v46 = vadd.f32 %v3663_v50, %v3526_v44  ;;  %v3867_v14 = vadd.f32 %v3663_v50, %v3538_v52 }
 0x2b7   :  { %v3871_v19 = vadd.f32 %v3663_v50, %v3542_v51  ;;  %v3875_v44 = vadd.f32 %v3663_v50, %v4476_v12  ;;  %v3879_v26 = vadd.f32 %v3663_v50, %v4477_v34  ;;  %v3883_v16 = vadd.f32 %v3663_v50, %v3554_v29 }
 0x2b8   :  { %v3887_v52 = vadd.f32 %v3663_v50, %v3558_v47  ;;  %v3891_v51 = vadd.f32 %v3663_v50, %v4480_v20  ;;  %v3899_v34 = vadd.f32 %v3663_v50, %v3570_v53  ;;  %v3903_v29 = vadd.f32 %v3663_v50, %v3574_v38 }
 0x2b9   :  { %4475 = vst [vmem:[#allocation7_spill] sm:$0xff] %v3871_v19  ;;  %v4482_v19 = vld [vmem:[#allocation4_spill] sm:$0xff]  ;;  %v2039_v47 = vmax.f32 %v3719_v6, 0.0  ;;  %v2041_v20 = vmax.f32 %v3727_v54, 0.0  ;;  %v2045_v53 = vmax.f32 %v3743_v57, 0.0  ;;  %v3915_v38 = vadd.f32 %v3663_v50, %v3578_v41 }
 0x2ba   :  { %4478 = vst [vmem:[#allocation11_spill] sm:$0xff] %v3883_v16  ;;  %v3895_v12 = vadd.f32 %v3663_v50, %v4482_v19  ;;  %v2038_v16 = vmax.f32 %v3715_v33, 0.0  ;;  %v2043_v19 = vmax.f32 %v3735_v31, 0.0  ;;  %v2046_v6 = vmax.f32 %v3747_v7, 0.0  ;;  %v4488_v54 = vld [vmem:[#allocation8_spill] sm:$0xff] }
 0x2bb   :  { %4479 = vst [vmem:[#allocation12_spill] sm:$0xff] %v3887_v52  ;;  %v2040_v52 = vmax.f32 %v3723_v28, 0.0  ;;  %v2047_v28 = vmax.f32 %v3751_v59, 0.0  ;;  %v3929_v31 = vadd.f32 %v3663_v50, %v3590_v15  ;;  %v2049_v41 = vmax.f32 %v3759_v40, 0.0 }
 0x2bc   :  { %4481 = vst [vmem:[#allocation18_spill] sm:$0xff] %v3891_v51  ;;  %v2042_v51 = vmax.f32 %v3731_v24, 0.0  ;;  %v3925_v24 = vadd.f32 %v3663_v50, %v4488_v54  ;;  %v2050_v57 = vmax.f32 %v3763_v32, 0.0  ;;  %v2052_v59 = vmax.f32 %v3771_v21, 0.0 }
 0x2bd   :  { %4483 = vst [vmem:[#allocation21_spill] sm:$0xff] %v3895_v12  ;;  %v2044_v12 = vmax.f32 %v3739_v18, 0.0  ;;  %v2048_v18 = vmax.f32 %v3755_v35, 0.0  ;;  %v2533_v7 = vpack.c.bf16 %v2041_v20, %v2040_v52  ;;  %v3939_v15 = vadd.f32 %v3663_v50, %v3594_v60 }
 0x2be   :  { %4484 = vst [vmem:[#allocation28_spill] sm:$0xff] %v3903_v29  ;;  %v4486_v29 = vld [vmem:[#allocation6_spill] sm:$0xff]  ;;  %v2538_v54 = vpack.c.bf16 %v2043_v19, %v2042_v51  ;;  %v2054_v35 = vmax.f32 %v3779_v58, 0.0  ;;  %v2055_v40 = vmax.f32 %v3783_v62, 0.0  ;;  %v2548_v32 = vpack.c.bf16 %v2047_v28, %v2046_v6  ;;  %v4492_v28 = vld [vmem:[#allocation20_spill] sm:$0xff] }
 0x2bf   :  { %4485 = vst [vmem:[#allocation32_spill] sm:$0xff] %v3915_v38  ;;  %v3919_v33 = vadd.f32 %v3663_v50, %v4486_v29  ;;  %v2051_v29 = vmax.f32 %v3767_v63, 0.0  ;;  %v2053_v38 = vmax.f32 %v3775_v55, 0.0  ;;  %v3948_v63 = vadd.f32 %v3663_v50, %v3598_v23 }
 0x2c0   :  { %4489 = vst [vmem:[#allocation46_spill] sm:$0xff] %v3925_v24  ;;  %v2543_v24 = vpack.c.bf16 %v2045_v53, %v2044_v12  ;;  %v2056_v21 = vmax.f32 %v3787_v1, 0.0  ;;  %v2057_v55 = vmax.f32 %v3791_v4, 0.0  ;;  %v2553_v60 = vpack.c.bf16 %v2049_v41, %v2048_v18  ;;  %v4493_v18 = vld [vmem:[#allocation7_spill] sm:$0xff] }
 0x2c1   :  { %4487 = vst [vmem:[#allocation43_spill] sm:$0xff] %v3919_v33  ;;  %v2528_v33 = vpack.c.bf16 %v2039_v47, %v2038_v16  ;;  %v3957_v58 = vadd.f32 %v3663_v50, %v3602_v27  ;;  %v2058_v62 = vmax.f32 %v3795_v39, 0.0  ;;  %v2059_v16 = vmax.f32 %v3799_v49, 0.0 }
 0x2c2   :  { %2725 = vst [vmem:[%s4215_s4 + $0x8] sm:$0xff] %v2533_v7   ;;  %v2558_v23 = vpack.c.bf16 %v2051_v29, %v2050_v57  ;;  %v3966_v1 = vadd.f32 %v3663_v50, %v3606_v10  ;;  %v2060_v4 = vmax.f32 %v3803_v3, 0.0  ;;  %v2061_v52 = vmax.f32 %v3807_v42, 0.0  ;;  %v4494_v57 = vld [vmem:[#allocation23_spill] sm:$0xff] }
 0x2c3   :  { %2529 = vst [vmem:[%s4215_s4] sm:$0xff] %v2528_v33   ;;  %v2563_v27 = vpack.c.bf16 %v2053_v38, %v2052_v59  ;;  %v3975_v39 = vadd.f32 %v3663_v50, %v3610_v13  ;;  %v2062_v49 = vmax.f32 %v3811_v45, 0.0  ;;  %v2063_v51 = vmax.f32 %v3815_v11, 0.0  ;;  %v4495_v59 = vld [vmem:[#allocation24_spill] sm:$0xff] }
 0x2c4   :  { %2726 = vst [vmem:[%s4215_s4 + $0x10] sm:$0xff] %v2538_v54   ;;  %v2568_v10 = vpack.c.bf16 %v2055_v40, %v2054_v35  ;;  %v3984_v3 = vadd.f32 %v3663_v50, %v3614_v36  ;;  %v2064_v42 = vmax.f32 %v3819_v0, 0.0  ;;  %v2065_v12 = vmax.f32 %v3823_v43, 0.0  ;;  %v4496_v35 = vld [vmem:[#allocation11_spill] sm:$0xff] }
 0x2c5   :  { %2727 = vst [vmem:[%s4215_s4 + $0x18] sm:$0xff] %v2543_v24   ;;  %v2573_v13 = vpack.c.bf16 %v2057_v55, %v2056_v21  ;;  %v3993_v45 = vadd.f32 %v3663_v50, %v3618_v30  ;;  %v2066_v11 = vmax.f32 %v3827_v25, 0.0  ;;  %v2067_v47 = vmax.f32 %v3831_v5, 0.0  ;;  %v4498_v55 = vld [vmem:[#allocation26_spill] sm:$0xff] }
 0x2c6   :  { %2728 = vst [vmem:[%s4215_s4 + $0x20] sm:$0xff] %v2548_v32   ;;  %v2578_v36 = vpack.c.bf16 %v2059_v16, %v2058_v62  ;;  %v4002_v0 = vadd.f32 %v3663_v50, %v3622_v2  ;;  %v2068_v43 = vmax.f32 %v3835_v22, 0.0  ;;  %v2069_v20 = vmax.f32 %v3839_v56, 0.0  ;;  %v4490_v22 = vld [vmem:[#allocation16_spill] sm:$0xff]  ;;  %v4500_v16 = vld [vmem:[#allocation21_spill] sm:$0xff] }
 0x2c7   :  { %2729 = vst [vmem:[%s4215_s4 + $0x28] sm:$0xff] %v2553_v60   ;;  %v2583_v30 = vpack.c.bf16 %v2061_v52, %v2060_v4  ;;  %v4011_v25 = vadd.f32 %v3663_v50, %v3626_v9  ;;  %v2070_v5 = vmax.f32 %v3843_v17, 0.0  ;;  %v2071_v19 = vmax.f32 %v3847_v48, 0.0  ;;  %v4491_v17 = vld [vmem:[#allocation19_spill] sm:$0xff]  ;;  %v4497_v32 = vld [vmem:[#allocation12_spill] sm:$0xff]  ;;  %v4499_v60 = vld [vmem:[#allocation18_spill] sm:$0xff] }
 0x2c8   :  { %2730 = vst [vmem:[%s4215_s4 + $0x30] sm:$0xff] %v2558_v23   ;;  %v2588_v2 = vpack.c.bf16 %v2063_v51, %v2062_v49  ;;  %v4020_v56 = vadd.f32 %v3663_v50, %v4490_v22  ;;  %v2072_v53 = vmax.f32 %v3851_v61, 0.0  ;;  %v2073_v38 = vmax.f32 %v3855_v46, 0.0  ;;  %v4501_v52 = vld [vmem:[#allocation29_spill] sm:$0xff]  ;;  %v4502_v51 = vld [vmem:[#allocation28_spill] sm:$0xff] }
 0x2c9   :  { %2731 = vst [vmem:[%s4215_s4 + $0x38] sm:$0xff] %v2563_v27   ;;  %v2593_v9 = vpack.c.bf16 %v2065_v12, %v2064_v42  ;;  %v4029_v48 = vadd.f32 %v3663_v50, %v4491_v17  ;;  %v2074_v33 = vmax.f32 %v3859_v8, 0.0  ;;  %v2075_v6 = vmax.f32 %v3863_v37, 0.0  ;;  %v4503_v12 = vld [vmem:[#allocation35_spill] sm:$0xff] }
 0x2ca   :  { %2732 = vst [vmem:[%s4215_s4 + $0x40] sm:$0xff] %v2568_v10   ;;  %v2598_v61 = vpack.c.bf16 %v2067_v47, %v2066_v11  ;;  %v4038_v46 = vadd.f32 %v3663_v50, %v4492_v28  ;;  %v2076_v24 = vmax.f32 %v3867_v14, 0.0  ;;  %v2077_v41 = vmax.f32 %v4493_v18, 0.0  ;;  %v4504_v11 = vld [vmem:[#allocation32_spill] sm:$0xff] }
 0x2cb   :  { %2733 = vst [vmem:[%s4215_s4 + $0x48] sm:$0xff] %v2573_v13   ;;  %v2603_v8 = vpack.c.bf16 %v2069_v20, %v2068_v43  ;;  %v4047_v37 = vadd.f32 %v3663_v50, %v4494_v57  ;;  %v2078_v29 = vmax.f32 %v3875_v44, 0.0  ;;  %v2079_v7 = vmax.f32 %v3879_v26, 0.0  ;;  %v4506_v20 = vld [vmem:[#allocation37_spill] sm:$0xff] }
 0x2cc   :  { %2734 = vst [vmem:[%s4215_s4 + $0x50] sm:$0xff] %v2578_v36   ;;  %v2608_v14 = vpack.c.bf16 %v2071_v19, %v2070_v5  ;;  %v4056_v54 = vadd.f32 %v3663_v50, %v4495_v59  ;;  %v2080_v40 = vmax.f32 %v4496_v35, 0.0  ;;  %v2081_v21 = vmax.f32 %v4497_v32, 0.0  ;;  %v4505_v36 = vld [vmem:[#allocation43_spill] sm:$0xff]  ;;  %v4507_v5 = vld [vmem:[#allocation46_spill] sm:$0xff] }
 0x2cd   :  { %2735 = vst [vmem:[%s4215_s4 + $0x58] sm:$0xff] %v2583_v30   ;;  %v2613_v44 = vpack.c.bf16 %v2073_v38, %v2072_v53  ;;  %v4065_v26 = vadd.f32 %v3663_v50, %v4498_v55  ;;  %v2082_v62 = vmax.f32 %v4499_v60, 0.0  ;;  %v2083_v23 = vmax.f32 %v4500_v16, 0.0  ;;  %v4508_v53 = vld [vmem:[#allocation5_spill] sm:$0xff] }
 0x2ce   :  { %2736 = vst [vmem:[%s4215_s4 + $0x60] sm:$0xff] %v2588_v2   ;;  %v2618_v4 = vpack.c.bf16 %v2075_v6, %v2074_v33  ;;  %v4074_v27 = vadd.f32 %v3663_v50, %v4501_v52  ;;  %v2084_v49 = vmax.f32 %v3899_v34, 0.0  ;;  %v2085_v10 = vmax.f32 %v4502_v51, 0.0  ;;  %v4509_v6 = vld [vmem:[#allocation9_spill] sm:$0xff] }
 0x2cf   :  { %2737 = vst [vmem:[%s4215_s4 + $0x68] sm:$0xff] %v2593_v9   ;;  %v2623_v42 = vpack.c.bf16 %v2077_v41, %v2076_v24  ;;  %v4083_v13 = vadd.f32 %v3663_v50, %v4503_v12  ;;  %v2086_v47 = vmax.f32 %v4504_v11, 0.0  ;;  %v2087_v43 = vmax.f32 %v4505_v36, 0.0  ;;  %v4518_v12 = vld [vmem:[#allocation48_spill] sm:$0xff] }
 0x2d0   :  { %2738 = vst [vmem:[%s4215_s4 + $0x70] sm:$0xff] %v2598_v61   ;;  %v2628_v34 = vpack.c.bf16 %v2079_v7, %v2078_v29  ;;  %v4092_v30 = vadd.f32 %v3663_v50, %v4506_v20  ;;  %v2088_v19 = vmax.f32 %v4507_v5, 0.0  ;;  %v2089_v2 = vmax.f32 %v3929_v31, 0.0 }
 0x2d1   :  { %2739 = vst [vmem:[%s4215_s4 + $0x78] sm:$0xff] %v2603_v8   ;;  %v2633_v22 = vpack.c.bf16 %v2081_v21, %v2080_v40  ;;  %v4101_v38 = vadd.f32 %v3663_v50, %v4508_v53  ;;  %v2090_v9 = vmax.f32 %v3939_v15, 0.0  ;;  %v2091_v17 = vmax.f32 %v3948_v63, 0.0  ;;  %v4510_v15 = vld [vmem:[#allocation10_spill] sm:$0xff] }
 0x2d2   :  { %2740 = vst [vmem:[%s4215_s4 + $0x80] sm:$0xff] %v2608_v14   ;;  %v2638_v33 = vpack.c.bf16 %v2083_v23, %v2082_v62  ;;  %v2028_v31 = vadd.f32 %v3663_v50, %v4509_v6  ;;  %v2092_v61 = vmax.f32 %v3957_v58, 0.0  ;;  %v2093_v28 = vmax.f32 %v3966_v1, 0.0  ;;  %v4511_v58 = vld [vmem:[#allocation13_spill] sm:$0xff] }
 0x2d3   :  { %2741 = vst [vmem:[%s4215_s4 + $0x88] sm:$0xff] %v2613_v44   ;;  %v2643_v24 = vpack.c.bf16 %v2085_v10, %v2084_v49  ;;  %v2029_v63 = vadd.f32 %v3663_v50, %v4510_v15  ;;  %v2094_v18 = vmax.f32 %v3975_v39, 0.0  ;;  %v2095_v41 = vmax.f32 %v3984_v3, 0.0  ;;  %v4512_v39 = vld [vmem:[#allocation15_spill] sm:$0xff] }
 0x2d4   :  { %2742 = vst [vmem:[%s4215_s4 + $0x90] sm:$0xff] %v2618_v4   ;;  %v2648_v8 = vpack.c.bf16 %v2087_v43, %v2086_v47  ;;  %v2030_v1 = vadd.f32 %v3663_v50, %v4511_v58  ;;  %v2096_v57 = vmax.f32 %v3993_v45, 0.0  ;;  %v2097_v29 = vmax.f32 %v4002_v0, 0.0  ;;  %v4513_v45 = vld [vmem:[#allocation22_spill] sm:$0xff] }
 0x2d5   :  { %2743 = vst [vmem:[%s4215_s4 + $0x98] sm:$0xff] %v2623_v42   ;;  %v2653_v7 = vpack.c.bf16 %v2089_v2, %v2088_v19  ;;  %v2031_v3 = vadd.f32 %v3663_v50, %v4512_v39  ;;  %v2098_v14 = vmax.f32 %v4011_v25, 0.0  ;;  %v2099_v59 = vmax.f32 %v4020_v56, 0.0  ;;  %v4514_v25 = vld [vmem:[#allocation25_spill] sm:$0xff] }
 0x2d6   :  { %2744 = vst [vmem:[%s4215_s4 + $0xa0] sm:$0xff] %v2628_v34   ;;  %v2658_v35 = vpack.c.bf16 %v2091_v17, %v2090_v9  ;;  %v2032_v0 = vadd.f32 %v3663_v50, %v4513_v45  ;;  %v2100_v40 = vmax.f32 %v4029_v48, 0.0  ;;  %v2101_v32 = vmax.f32 %v4038_v46, 0.0  ;;  %v4515_v48 = vld [vmem:[#allocation27_spill] sm:$0xff] }
 0x2d7   :  { %2745 = vst [vmem:[%s4215_s4 + $0xa8] sm:$0xff] %v2633_v22   ;;  %v2663_v21 = vpack.c.bf16 %v2093_v28, %v2092_v61  ;;  %v2033_v56 = vadd.f32 %v3663_v50, %v4514_v25  ;;  %v2102_v44 = vmax.f32 %v4047_v37, 0.0  ;;  %v2103_v55 = vmax.f32 %v4056_v54, 0.0  ;;  %v4516_v37 = vld [vmem:[#allocation34_spill] sm:$0xff] }
 0x2d8   :  { %2746 = vst [vmem:[%s4215_s4 + $0xb0] sm:$0xff] %v2638_v33   ;;  %v2668_v60 = vpack.c.bf16 %v2095_v41, %v2094_v18  ;;  %v2034_v46 = vadd.f32 %v3663_v50, %v4515_v48  ;;  %v2104_v62 = vmax.f32 %v4065_v26, 0.0  ;;  %v2105_v16 = vmax.f32 %v4074_v27, 0.0  ;;  %v4517_v26 = vld [vmem:[#allocation39_spill] sm:$0xff] }
 0x2d9   :  { %2747 = vst [vmem:[%s4215_s4 + $0xb8] sm:$0xff] %v2643_v24   ;;  %v2673_v23 = vpack.c.bf16 %v2097_v29, %v2096_v57  ;;  %v2035_v54 = vadd.f32 %v3663_v50, %v4516_v37  ;;  %v2106_v4 = vmax.f32 %v4083_v13, 0.0  ;;  %v2107_v52 = vmax.f32 %v4092_v30, 0.0 }
 0x2da   :  { %2748 = vst [vmem:[%s4215_s4 + $0xc0] sm:$0xff] %v2648_v8   ;;  %v2678_v49 = vpack.c.bf16 %v2099_v59, %v2098_v14  ;;  %v2036_v27 = vadd.f32 %v3663_v50, %v4517_v26  ;;  %v2108_v51 = vmax.f32 %v4101_v38, 0.0  ;;  %v2109_v10 = vmax.f32 %v2028_v31, 0.0 }
 0x2db   :  { %2749 = vst [vmem:[%s4215_s4 + $0xc8] sm:$0xff] %v2653_v7   ;;  %v2683_v42 = vpack.c.bf16 %v2101_v32, %v2100_v40  ;;  %v2037_v13 = vadd.f32 %v3663_v50, %v4518_v12  ;;  %v2110_v11 = vmax.f32 %v2029_v63, 0.0  ;;  %v2111_v47 = vmax.f32 %v2030_v1, 0.0 }
 0x2dc   :  { %2750 = vst [vmem:[%s4215_s4 + $0xd0] sm:$0xff] %v2658_v35   ;;  %v2688_v36 = vpack.c.bf16 %v2103_v55, %v2102_v44  ;;  %v2112_v43 = vmax.f32 %v2031_v3, 0.0  ;;  %v2113_v34 = vmax.f32 %v2032_v0, 0.0  ;;  %v2693_v20 = vpack.c.bf16 %v2105_v16, %v2104_v62 }
 0x2dd   :  { %2751 = vst [vmem:[%s4215_s4 + $0xd8] sm:$0xff] %v2663_v21   ;;  %v2114_v30 = vmax.f32 %v2033_v56, 0.0  ;;  %v2115_v5 = vmax.f32 %v2034_v46, 0.0  ;;  %v2698_v50 = vpack.c.bf16 %v2107_v52, %v2106_v4  ;;  %v2116_v19 = vmax.f32 %v2035_v54, 0.0 }
 0x2de   :  { %2752 = vst [vmem:[%s4215_s4 + $0xe0] sm:$0xff] %v2668_v60   ;;  %v2117_v2 = vmax.f32 %v2036_v27, 0.0  ;;  %v2703_v22 = vpack.c.bf16 %v2109_v10, %v2108_v51  ;;  %v2118_v53 = vmax.f32 %v2037_v13, 0.0  ;;  %v2708_v38 = vpack.c.bf16 %v2111_v47, %v2110_v11 }
 0x2df   :  { %2753 = vst [vmem:[%s4215_s4 + $0xe8] sm:$0xff] %v2673_v23   ;;  %v2713_v9 = vpack.c.bf16 %v2113_v34, %v2112_v43  ;;  %v2718_v17 = vpack.c.bf16 %v2115_v5, %v2114_v30 }
 0x2e0   :  { %2754 = vst [vmem:[%s4215_s4 + $0xf0] sm:$0xff] %v2678_v49   ;;  %v2723_v33 = vpack.c.bf16 %v2117_v2, %v2116_v19  ;;  %v2199_v6 = vpack.c.bf16 %v2118_v53, %v2118_v53 }
 0x2e1   :  { %2755 = vst [vmem:[%s4215_s4 + $0xf8] sm:$0xff] %v2683_v42  }
 0x2e2   :  { %2756 = vst [vmem:[%s4215_s4 + $0x100] sm:$0xff] %v2688_v36  }
 0x2e3   :  { %2757 = vst [vmem:[%s4215_s4 + $0x108] sm:$0xff] %v2693_v20  }
 0x2e4   :  { %2758 = vst [vmem:[%s4215_s4 + $0x110] sm:$0xff] %v2698_v50  }
 0x2e5   :  { %2759 = vst [vmem:[%s4215_s4 + $0x118] sm:$0xff] %v2703_v22  }
 0x2e6   :  { %2760 = vst [vmem:[%s4215_s4 + $0x120] sm:$0xff] %v2708_v38  }
 0x2e7   :  { %2761 = vst [vmem:[%s4215_s4 + $0x128] sm:$0xff] %v2713_v9  }
 0x2e8   :  { %2762 = vst [vmem:[%s4215_s4 + $0x130] sm:$0xff] %v2718_v17  }
 0x2e9   :  { %2763 = vst [vmem:[%s4215_s4 + $0x138] sm:$0xff] %v2723_v33  }
 0x2ea   :  { %2280 = vst [vmem:[%s4215_s4 + $0x140] sm:$0xf] %v2199_v6 }

// kernel: dqn_forward.5
= control target key start
LH: loop header
LB: loop body
LE: loop exit
PB: predicated region body
PF: predicated region fallthrough
CT: control target
= control target key end

     0   :  { %s1610_s1 = inlined_call_operand.vmem [shape: bf16[512,128], index: 1, kind: input, shape index: {}]   ;;  %s1611_s0 = inlined_call_operand.vmem [shape: bf16[104,512], index: 0, kind: input, shape index: {}]   ;;  %s1612_s2 = inlined_call_operand.vmem [shape: f32[1,128], index: 2, kind: input, shape index: {}]   ;;  %s1613_s3 = inlined_call_operand.vmem [shape: f32[1,128], index: 3, kind: input, shape index: {}]   ;;  %s1614_s4 = inlined_call_operand.vmem [shape: bf16[104,128], index: 4, kind: output, shape index: {}]  }
   0x1   :  { %v1167_v0 = vld [vmem:[%s1610_s1 + $0x38] sm:$0xff]  ;;  %v1166_v4 = vld [vmem:[%s1610_s1 + $0x30] sm:$0xff]  ;;  %v1165_v8 = vld [vmem:[%s1610_s1 + $0x28] sm:$0xff] }
   0x2   :  { %v1175_v1 = vld [vmem:[%s1610_s1 + $0x78] sm:$0xff]  ;;  %463 = vmatpush.bf16.msra.mxu0 %v1167_v0  ;;  %v1174_v5 = vld [vmem:[%s1610_s1 + $0x70] sm:$0xff]  ;;  %v1173_v9 = vld [vmem:[%s1610_s1 + $0x68] sm:$0xff] }
   0x3   :  { %v1183_v2 = vld [vmem:[%s1610_s1 + $0xb8] sm:$0xff]  ;;  %506 = vmatpush.bf16.msra.mxu1 %v1175_v1  ;;  %v1182_v6 = vld [vmem:[%s1610_s1 + $0xb0] sm:$0xff]  ;;  %v1181_v10 = vld [vmem:[%s1610_s1 + $0xa8] sm:$0xff] }
   0x4   :  { %v1191_v3 = vld [vmem:[%s1610_s1 + $0xf8] sm:$0xff]  ;;  %549 = vmatpush.bf16.msra.mxu2 %v1183_v2  ;;  %v1190_v7 = vld [vmem:[%s1610_s1 + $0xf0] sm:$0xff]  ;;  %v1189_v11 = vld [vmem:[%s1610_s1 + $0xe8] sm:$0xff] }
   0x5   :  { %592 = vmatpush.bf16.msra.mxu3 %v1191_v3  ;;  %v1164_v12 = vld [vmem:[%s1610_s1 + $0x20] sm:$0xff]  ;;  %v1163_v16 = vld [vmem:[%s1610_s1 + $0x18] sm:$0xff]  ;;  %v1162_v20 = vld [vmem:[%s1610_s1 + $0x10] sm:$0xff] }
   0x6   :  { %464 = vmatpush.bf16.msra.mxu0 %v1166_v4  ;;  %v1172_v13 = vld [vmem:[%s1610_s1 + $0x60] sm:$0xff]  ;;  %v1171_v17 = vld [vmem:[%s1610_s1 + $0x58] sm:$0xff]  ;;  %v1170_v21 = vld [vmem:[%s1610_s1 + $0x50] sm:$0xff] }
   0x7   :  { %507 = vmatpush.bf16.msra.mxu1 %v1174_v5  ;;  %v1180_v14 = vld [vmem:[%s1610_s1 + $0xa0] sm:$0xff]  ;;  %v1179_v18 = vld [vmem:[%s1610_s1 + $0x98] sm:$0xff]  ;;  %v1178_v22 = vld [vmem:[%s1610_s1 + $0x90] sm:$0xff] }
   0x8   :  { %550 = vmatpush.bf16.msra.mxu2 %v1182_v6  ;;  %v1188_v15 = vld [vmem:[%s1610_s1 + $0xe0] sm:$0xff]  ;;  %v1187_v19 = vld [vmem:[%s1610_s1 + $0xd8] sm:$0xff]  ;;  %v1186_v23 = vld [vmem:[%s1610_s1 + $0xd0] sm:$0xff] }
   0x9   :  { %593 = vmatpush.bf16.msra.mxu3 %v1190_v7  ;;  %v1161_v24 = vld [vmem:[%s1610_s1 + $0x8] sm:$0xff]  ;;  %v1160_v28 = vld [vmem:[%s1610_s1] sm:$0xff]  ;;  %v1138_v33 = vld [vmem:[%s1611_s0 + $0xc] sm:$0xf0] }
   0xa   :  { %465 = vmatpush.bf16.msra.mxu0 %v1165_v8  ;;  %v1169_v25 = vld [vmem:[%s1610_s1 + $0x48] sm:$0xff]  ;;  %v1168_v29 = vld [vmem:[%s1610_s1 + $0x40] sm:$0xff]  ;;  %v915_v35 = vld [vmem:[%s1611_s0 + $0x10] sm:$0xf0] }
   0xb   :  { %508 = vmatpush.bf16.msra.mxu1 %v1173_v9  ;;  %v1177_v26 = vld [vmem:[%s1610_s1 + $0x88] sm:$0xff]  ;;  %v1176_v30 = vld [vmem:[%s1610_s1 + $0x80] sm:$0xff]  ;;  %v1139_v37 = vld [vmem:[%s1611_s0 + $0x14] sm:$0xf0] }
   0xc   :  { %551 = vmatpush.bf16.msra.mxu2 %v1181_v10  ;;  %v1185_v27 = vld [vmem:[%s1610_s1 + $0xc8] sm:$0xff]  ;;  %v1184_v31 = vld [vmem:[%s1610_s1 + $0xc0] sm:$0xff]  ;;  %v923_v39 = vld [vmem:[%s1611_s0 + $0x18] sm:$0xf0] }
   0xd   :  { %594 = vmatpush.bf16.msra.mxu3 %v1189_v11  ;;  %v913_v32 = vld [vmem:[%s1611_s0] sm:$0xf]  ;;  %v1136_v34 = vld [vmem:[%s1611_s0 + $0x4] sm:$0xf]  ;;  %v921_v36 = vld [vmem:[%s1611_s0 + $0x8] sm:$0xf] }
   0xe   :  { %466 = vmatpush.bf16.msra.mxu0 %v1164_v12  ;;  %v1137_v38 = vld [vmem:[%s1611_s0 + $0xc] sm:$0xf]  ;;  %v914_v40 = vor.u32 %v1138_v33, %v913_v32  ;;  %v918_v41 = vor.u32 %v1136_v34, %v915_v35  ;;  %v922_v42 = vor.u32 %v1139_v37, %v921_v36  ;;  %v929_v44 = vld [vmem:[%s1611_s0 + $0x20] sm:$0xf]  ;;  %v1142_v45 = vld [vmem:[%s1611_s0 + $0x2c] sm:$0xf0] }
   0xf   :  { %509 = vmatpush.bf16.msra.mxu1 %v1172_v13  ;;  %v926_v43 = vor.u32 %v1137_v38, %v923_v39  ;;  %v1140_v46 = vld [vmem:[%s1611_s0 + $0x24] sm:$0xf]  ;;  %v931_v47 = vld [vmem:[%s1611_s0 + $0x30] sm:$0xf0]  ;;  %v937_v48 = vld [vmem:[%s1611_s0 + $0x28] sm:$0xf]  ;;  %v930_v52 = vor.u32 %v1142_v45, %v929_v44 }
  0x10   :  { %552 = vmatpush.bf16.msra.mxu2 %v1180_v14  ;;  %v1143_v49 = vld [vmem:[%s1611_s0 + $0x34] sm:$0xf0]  ;;  %v1141_v50 = vld [vmem:[%s1611_s0 + $0x2c] sm:$0xf]  ;;  %v939_v51 = vld [vmem:[%s1611_s0 + $0x38] sm:$0xf0]  ;;  %v934_v53 = vor.u32 %v1140_v46, %v931_v47 }
  0x11   :  { %595 = vmatpush.bf16.msra.mxu3 %v1188_v15  ;;  %v938_v54 = vor.u32 %v1143_v49, %v937_v48  ;;  %v942_v55 = vor.u32 %v1141_v50, %v939_v51  ;;  %v945_v56 = vld [vmem:[%s1611_s0 + $0x40] sm:$0xf]  ;;  %v1146_v57 = vld [vmem:[%s1611_s0 + $0x4c] sm:$0xf0]  ;;  %v1144_v58 = vld [vmem:[%s1611_s0 + $0x44] sm:$0xf] }
  0x12   :  { %467 = vmatpush.bf16.msra.mxu0 %v1163_v16  ;;  %v947_v59 = vld [vmem:[%s1611_s0 + $0x50] sm:$0xf0]  ;;  %v953_v60 = vld [vmem:[%s1611_s0 + $0x48] sm:$0xf]  ;;  %v1147_v61 = vld [vmem:[%s1611_s0 + $0x54] sm:$0xf0]  ;;  %v946_v0 = vor.u32 %v1146_v57, %v945_v56 }
  0x13   :  { %510 = vmatpush.bf16.msra.mxu1 %v1171_v17  ;;  %v1145_v62 = vld [vmem:[%s1611_s0 + $0x4c] sm:$0xf]  ;;  %v955_v63 = vld [vmem:[%s1611_s0 + $0x58] sm:$0xf0]  ;;  %v950_v1 = vor.u32 %v1144_v58, %v947_v59  ;;  %v954_v2 = vor.u32 %v1147_v61, %v953_v60  ;;  %v961_v4 = vld [vmem:[%s1611_s0 + $0x60] sm:$0xf] }
  0x14   :  { %553 = vmatpush.bf16.msra.mxu2 %v1179_v18  ;;  %v958_v3 = vor.u32 %v1145_v62, %v955_v63  ;;  %v1150_v5 = vld [vmem:[%s1611_s0 + $0x6c] sm:$0xf0]  ;;  %v1148_v6 = vld [vmem:[%s1611_s0 + $0x64] sm:$0xf]  ;;  %v963_v7 = vld [vmem:[%s1611_s0 + $0x70] sm:$0xf0] }
  0x15   :  { %596 = vmatpush.bf16.msra.mxu3 %v1187_v19  ;;  %v969_v8 = vld [vmem:[%s1611_s0 + $0x68] sm:$0xf]  ;;  %v1151_v9 = vld [vmem:[%s1611_s0 + $0x74] sm:$0xf0]  ;;  %v1149_v10 = vld [vmem:[%s1611_s0 + $0x6c] sm:$0xf]  ;;  %v962_v12 = vor.u32 %v1150_v5, %v961_v4  ;;  %v966_v13 = vor.u32 %v1148_v6, %v963_v7 }
  0x16   :  { %468 = vmatpush.bf16.msra.mxu0 %v1162_v20  ;;  %v971_v11 = vld [vmem:[%s1611_s0 + $0x78] sm:$0xf0]  ;;  %v970_v14 = vor.u32 %v1151_v9, %v969_v8  ;;  %v977_v16 = vld [vmem:[%s1611_s0 + $0x80] sm:$0xf]  ;;  %v1154_v17 = vld [vmem:[%s1611_s0 + $0x8c] sm:$0xf0] }
  0x17   :  { %511 = vmatpush.bf16.msra.mxu1 %v1170_v21  ;;  %v974_v15 = vor.u32 %v1149_v10, %v971_v11  ;;  %v1152_v18 = vld [vmem:[%s1611_s0 + $0x84] sm:$0xf]  ;;  %v979_v19 = vld [vmem:[%s1611_s0 + $0x90] sm:$0xf0]  ;;  %v985_v20 = vld [vmem:[%s1611_s0 + $0x88] sm:$0xf] }
  0x18   :  { %554 = vmatpush.bf16.msra.mxu2 %v1178_v22  ;;  %v1155_v21 = vld [vmem:[%s1611_s0 + $0x94] sm:$0xf0]  ;;  %v1153_v22 = vld [vmem:[%s1611_s0 + $0x8c] sm:$0xf]  ;;  %v1001_v32 = vld [vmem:[%s1611_s0 + $0xa8] sm:$0xf] }
  0x19   :  { %597 = vmatpush.bf16.msra.mxu3 %v1186_v23  ;;  %v987_v23 = vld [vmem:[%s1611_s0 + $0x98] sm:$0xf0]  ;;  %v1159_v33 = vld [vmem:[%s1611_s0 + $0xb4] sm:$0xf0]  ;;  %v1157_v34 = vld [vmem:[%s1611_s0 + $0xac] sm:$0xf] }
  0x1a   :  { %469 = vmatpush.bf16.msra.mxu0 %v1161_v24  ;;  %v978_v24 = vor.u32 %v1154_v17, %v977_v16  ;;  %v1003_v35 = vld [vmem:[%s1611_s0 + $0xb8] sm:$0xf0]  ;;  %v1002_v38 = vor.u32 %v1159_v33, %v1001_v32 }
  0x1b   :  { %512 = vmatpush.bf16.msra.mxu1 %v1169_v25  ;;  %v982_v25 = vor.u32 %v1152_v18, %v979_v19  ;;  %v1006_v39 = vor.u32 %v1157_v34, %v1003_v35 }
  0x1c   :  { %555 = vmatpush.bf16.msra.mxu2 %v1177_v26  ;;  %v986_v26 = vor.u32 %v1155_v21, %v985_v20 }
  0x1d   :  { %598 = vmatpush.bf16.msra.mxu3 %v1185_v27  ;;  %v990_v27 = vor.u32 %v1153_v22, %v987_v23 }
  0x1e   :  { %470 = vmatpush.bf16.msra.mxu0 %v1160_v28  ;;  %v993_v28 = vld [vmem:[%s1611_s0 + $0xa0] sm:$0xf] }
  0x1f   :  { %513 = vmatpush.bf16.msra.mxu1 %v1168_v29  ;;  %v1158_v29 = vld [vmem:[%s1611_s0 + $0xac] sm:$0xf0] }
  0x20   :  { %556 = vmatpush.bf16.msra.mxu2 %v1176_v30  ;;  %v1156_v30 = vld [vmem:[%s1611_s0 + $0xa4] sm:$0xf]  ;;  %v994_v36 = vor.u32 %v1158_v29, %v993_v28 }
  0x21   :  { %599 = vmatpush.bf16.msra.mxu3 %v1184_v31  ;;  %471 = vmatmul.bf16.vlgmr.msra.gmra.mxu0 %v914_v40  ;;  %v995_v31 = vld [vmem:[%s1611_s0 + $0xb0] sm:$0xf0]  ;;  %v71_v40 = vld [vmem:[%s1611_s0 + $0xc0] sm:$0xff] }
  0x22   :  { %514 = vmatmul.bf16.vlgmr.msra.gmra.mxu1 %v918_v41  ;;  %v998_v37 = vor.u32 %v1156_v30, %v995_v31  ;;  %v72_v41 = vld [vmem:[%s1611_s0 + $0xc8] sm:$0xff] }
  0x23   :  { %557 = vmatmul.bf16.vlgmr.msra.gmra.mxu2 %v922_v42  ;;  %v211_v42 = vunpack.c.l.b16 %v71_v40  ;;  %v213_v44 = vunpack.c.l.b16 %v72_v41  ;;  %v214_v45 = vunpack.c.h.b16 %v72_v41 }
  0x24   :  { %600 = vmatmul.bf16.vlgmr.msra.gmra.mxu3 %v926_v43  ;;  %v212_v43 = vunpack.c.h.b16 %v71_v40 }
  0x25   :  { %v239_v46 = vpack.c.b16 %v211_v42, %v211_v42  ;;  %v241_v48 = vpack.c.b16 %v213_v44, %v213_v44  ;;  %v242_v49 = vpack.c.b16 %v214_v45, %v214_v45 }
  0x26   :  { %v240_v47 = vpack.c.b16 %v212_v43, %v212_v43 }
  0x31   :  { %476 = vmatmul.bf16.gmra.mxu0 %v930_v52 }
  0x32   :  { %519 = vmatmul.bf16.gmra.mxu1 %v934_v53 }
  0x33   :  { %562 = vmatmul.bf16.gmra.mxu2 %v938_v54 }
  0x34   :  { %605 = vmatmul.bf16.gmra.mxu3 %v942_v55 }
  0x41   :  { %481 = vmatmul.bf16.gmra.mxu0 %v946_v0 }
  0x42   :  { %524 = vmatmul.bf16.gmra.mxu1 %v950_v1 }
  0x43   :  { %567 = vmatmul.bf16.gmra.mxu2 %v954_v2 }
  0x44   :  { %610 = vmatmul.bf16.gmra.mxu3 %v958_v3 }
  0x51   :  { %486 = vmatmul.bf16.gmra.mxu0 %v962_v12 }
  0x52   :  { %529 = vmatmul.bf16.gmra.mxu1 %v966_v13 }
  0x53   :  { %572 = vmatmul.bf16.gmra.mxu2 %v970_v14 }
  0x54   :  { %615 = vmatmul.bf16.gmra.mxu3 %v974_v15 }
  0x61   :  { %491 = vmatmul.bf16.gmra.mxu0 %v978_v24 }
  0x62   :  { %534 = vmatmul.bf16.gmra.mxu1 %v982_v25 }
  0x63   :  { %577 = vmatmul.bf16.gmra.mxu2 %v986_v26 }
  0x64   :  { %620 = vmatmul.bf16.gmra.mxu3 %v990_v27 }
  0x71   :  { %496 = vmatmul.bf16.gmra.mxu0 %v994_v36 }
  0x72   :  { %539 = vmatmul.bf16.gmra.mxu1 %v998_v37 }
  0x73   :  { %582 = vmatmul.bf16.gmra.mxu2 %v1002_v38 }
  0x74   :  { %625 = vmatmul.bf16.gmra.mxu3 %v1006_v39 }
  0x81   :  { %501 = vmatmul.bf16.gmra.mxu0 %v239_v46 }
  0x82   :  { %544 = vmatmul.bf16.gmra.mxu1 %v240_v47 }
  0x83   :  { %587 = vmatmul.bf16.gmra.mxu2 %v241_v48 }
  0x84   :  { %630 = vmatmul.bf16.gmra.mxu3 %v242_v49 }
  0x9e   :  { %v472_v50 = vpop.f32.mrf.mxu0 }
  0x9f   :  { %v515_v51 = vpop.f32.mrf.mxu1 }
  0xa0   :  { %v516_v52 = vadd.f32 %v515_v51, %v472_v50 }
  0xa6   :  { %v558_v53 = vpop.f32.mrf.mxu2  ;;  %v474_v56 = vpop.f32.mrf.mxu0 }
  0xa7   :  { %v601_v54 = vpop.f32.mrf.mxu3  ;;  %v559_v55 = vadd.f32 %v558_v53, %v516_v52  ;;  %v517_v57 = vpop.f32.mrf.mxu1 }
  0xa8   :  { %v518_v58 = vadd.f32 %v517_v57, %v474_v56 }
  0xa9   :  { %v1502_v59 = vadd.f32 %v601_v54, %v559_v55  ;;  %v677_v55 = vlaneseq }
  0xae   :  { %v560_v60 = vpop.f32.mrf.mxu2  ;;  %v477_v63 = vpop.f32.mrf.mxu0 }
  0xaf   :  { %v603_v61 = vpop.f32.mrf.mxu3  ;;  %v561_v62 = vadd.f32 %v560_v60, %v518_v58  ;;  %v520_v0 = vpop.f32.mrf.mxu1 }
  0xb0   :  { %v521_v1 = vadd.f32 %v520_v0, %v477_v63 }
  0xb1   :  { %v1504_v2 = vadd.f32 %v603_v61, %v561_v62 }
  0xb3   :  { %v743_v43 = vadd.f32 %v1504_v2, %v1502_v59 }
  0xb6   :  { %v563_v3 = vpop.f32.mrf.mxu2  ;;  %v479_v6 = vpop.f32.mrf.mxu0 }
  0xb7   :  { %v606_v4 = vpop.f32.mrf.mxu3  ;;  %v564_v5 = vadd.f32 %v563_v3, %v521_v1  ;;  %v522_v7 = vpop.f32.mrf.mxu1  ;;  %v678_v1 = vshrl.u32 %v677_v55, 7 }
  0xb8   :  { %v523_v8 = vadd.f32 %v522_v7, %v479_v6 }
  0xb9   :  { %v1506_v9 = vadd.f32 %v606_v4, %v564_v5 }
  0xbb   :  { %v744_v50 = vadd.f32 %v743_v43, %v1506_v9 }
  0xbe   :  { %v565_v10 = vpop.f32.mrf.mxu2  ;;  %v482_v12 = vpop.f32.mrf.mxu0 }
  0xbf   :  { %v608_v11 = vpop.f32.mrf.mxu3  ;;  %v525_v13 = vpop.f32.mrf.mxu1  ;;  %v566_v39 = vadd.f32 %v565_v10, %v523_v8 }
  0xc0   :  { %v526_v38 = vadd.f32 %v525_v13, %v482_v12 }
  0xc1   :  { %v1510_v44 = vadd.f32 %v608_v11, %v566_v39 }
  0xc3   :  { %v745_v56 = vadd.f32 %v744_v50, %v1510_v44 }
  0xc6   :  { %v568_v14 = vpop.f32.mrf.mxu2  ;;  %v484_v16 = vpop.f32.mrf.mxu0 }
  0xc7   :  { %v611_v15 = vpop.f32.mrf.mxu3  ;;  %v527_v17 = vpop.f32.mrf.mxu1  ;;  %v569_v40 = vadd.f32 %v568_v14, %v526_v38 }
  0xc8   :  { %v528_v41 = vadd.f32 %v527_v17, %v484_v16 }
  0xc9   :  { %v1513_v51 = vadd.f32 %v611_v15, %v569_v40  ;;  %v690_v15 = vadd.s32 96, %v678_v1 }
  0xcb   :  { %v746_v60 = vadd.f32 %v745_v56, %v1513_v51  ;;  %vm703_vm0 = vcmp.lt.s32.totalorder %v690_v15, 98 }
  0xce   :  { %v570_v18 = vpop.f32.mrf.mxu2  ;;  %v487_v20 = vpop.f32.mrf.mxu0 }
  0xcf   :  { %v613_v19 = vpop.f32.mrf.mxu3  ;;  %v530_v21 = vpop.f32.mrf.mxu1  ;;  %v571_v45 = vadd.f32 %v570_v18, %v528_v41 }
  0xd0   :  { %v531_v42 = vadd.f32 %v530_v21, %v487_v20 }
  0xd1   :  { %v1516_v57 = vadd.f32 %v613_v19, %v571_v45 }
  0xd3   :  { %v747_v3 = vadd.f32 %v746_v60, %v1516_v57 }
  0xd6   :  { %v573_v22 = vpop.f32.mrf.mxu2  ;;  %v489_v24 = vpop.f32.mrf.mxu0 }
  0xd7   :  { %v616_v23 = vpop.f32.mrf.mxu3  ;;  %v532_v25 = vpop.f32.mrf.mxu1  ;;  %v574_v52 = vadd.f32 %v573_v22, %v531_v42 }
  0xd8   :  { %v533_v53 = vadd.f32 %v532_v25, %v489_v24 }
  0xd9   :  { %v1519_v61 = vadd.f32 %v616_v23, %v574_v52 }
  0xdb   :  { %v748_v11 = vadd.f32 %v747_v3, %v1519_v61 }
  0xde   :  { %v575_v26 = vpop.f32.mrf.mxu2  ;;  %v492_v28 = vpop.f32.mrf.mxu0 }
  0xdf   :  { %v618_v27 = vpop.f32.mrf.mxu3  ;;  %v535_v29 = vpop.f32.mrf.mxu1  ;;  %v576_v58 = vadd.f32 %v575_v26, %v533_v53 }
  0xe0   :  { %v536_v54 = vadd.f32 %v535_v29, %v492_v28  ;;  %v1230_v29 = vmov 0.0  }
  0xe1   :  { %v1522_v6 = vadd.f32 %v618_v27, %v576_v58 }
  0xe3   :  { %v749_v16 = vadd.f32 %v748_v11, %v1522_v6 }
  0xe6   :  { %v578_v30 = vpop.f32.mrf.mxu2  ;;  %v494_v32 = vpop.f32.mrf.mxu0 }
  0xe7   :  { %v621_v31 = vpop.f32.mrf.mxu3  ;;  %v537_v33 = vpop.f32.mrf.mxu1  ;;  %v579_v62 = vadd.f32 %v578_v30, %v536_v54  ;;  %v1135_v30 = vsel %vm703_vm0, 1.0, %v1230_v29 }
  0xe8   :  { %v538_v63 = vadd.f32 %v537_v33, %v494_v32 }
  0xe9   :  { %v1525_v12 = vadd.f32 %v621_v31, %v579_v62 }
  0xeb   :  { %v750_v20 = vadd.f32 %v749_v16, %v1525_v12 }
  0xee   :  { %v580_v34 = vpop.f32.mrf.mxu2  ;;  %v497_v36 = vpop.f32.mrf.mxu0 }
  0xef   :  { %v623_v35 = vpop.f32.mrf.mxu3  ;;  %v540_v37 = vpop.f32.mrf.mxu1  ;;  %v581_v7 = vadd.f32 %v580_v34, %v538_v63 }
  0xf0   :  { %v541_v0 = vadd.f32 %v540_v37, %v497_v36 }
  0xf1   :  { %v1528_v17 = vadd.f32 %v623_v35, %v581_v7 }
  0xf3   :  { %v751_v24 = vadd.f32 %v750_v20, %v1528_v17 }
  0xf6   :  { %v583_v46 = vpop.f32.mrf.mxu2  ;;  %v499_v48 = vpop.f32.mrf.mxu0 }
  0xf7   :  { %v626_v47 = vpop.f32.mrf.mxu3  ;;  %v542_v49 = vpop.f32.mrf.mxu1  ;;  %v584_v13 = vadd.f32 %v583_v46, %v541_v0 }
  0xf8   :  { %v543_v14 = vadd.f32 %v542_v49, %v499_v48 }
  0xf9   :  { %v1531_v21 = vadd.f32 %v626_v47, %v584_v13 }
  0xfb   :  { %v752_v31 = vadd.f32 %v751_v24, %v1531_v21 }
  0xfe   :  { %v585_v4 = vpop.f32.mrf.mxu2  ;;  %v502_v8 = vpop.f32.mrf.mxu0 }
  0xff   :  { %v628_v5 = vpop.f32.mrf.mxu3  ;;  %v545_v10 = vpop.f32.mrf.mxu1  ;;  %v586_v18 = vadd.f32 %v585_v4, %v543_v14 }
 0x100   :  { %v546_v19 = vadd.f32 %v545_v10, %v502_v8 }
 0x101   :  { %v1534_v25 = vadd.f32 %v628_v5, %v586_v18 }
 0x103   :  { %v753_v33 = vadd.f32 %v752_v31, %v1534_v25 }
 0x106   :  { %v588_v22 = vpop.f32.mrf.mxu2  ;;  %v504_v27 = vpop.f32.mrf.mxu0 }
 0x107   :  { %v631_v23 = vpop.f32.mrf.mxu3  ;;  %v589_v26 = vadd.f32 %v588_v22, %v546_v19  ;;  %v547_v28 = vpop.f32.mrf.mxu1 }
 0x109   :  { %v1537_v32 = vadd.f32 %v631_v23, %v589_v26 }
 0x10b   :  { %v742_v34 = vmul.f32 %v1135_v30, %v1537_v32 }
 0x10d   :  { %v754_v35 = vadd.f32 %v753_v33, %v742_v34 }
 0x10e   :  { %v590_v36 = vpop.f32.mrf.mxu2 }
 0x10f   :  { %v633_v37 = vpop.f32.mrf.mxu3  ;;  %v755_v38 = vrot.slane %v754_v35, 4 }
 0x111   :  { %v756_v39 = vadd.f32 %v755_v38, %v754_v35 }
 0x113   :  { %v757_v40 = vrot.slane %v756_v39, 2 }
 0x115   :  { %v758_v41 = vadd.f32 %v757_v40, %v756_v39 }
 0x117   :  { %v759_v42 = vrot.slane %v758_v41, 1 }
 0x119   :  { %v760_v43 = vadd.f32 %v759_v42, %v758_v41 }
 0x11b   :  { %v1541_v45 = vmul.f32 0.010204081, %v760_v43 }
 0x11d   :  { %v762_v46 = vsub.f32 %v1502_v59, %v1541_v45  ;;  %v763_v47 = vsub.f32 %v1504_v2, %v1541_v45  ;;  %v764_v48 = vsub.f32 %v1506_v9, %v1541_v45  ;;  %v765_v52 = vsub.f32 %v1510_v44, %v1541_v45 }
 0x11e   :  { %v766_v53 = vsub.f32 %v1513_v51, %v1541_v45  ;;  %v767_v56 = vsub.f32 %v1516_v57, %v1541_v45  ;;  %v768_v62 = vsub.f32 %v1519_v61, %v1541_v45  ;;  %v769_v1 = vsub.f32 %v1522_v6, %v1541_v45 }
 0x11f   :  { %v788_v49 = vmul.f32 %v762_v46, %v762_v46  ;;  %v789_v50 = vmul.f32 %v763_v47, %v763_v47  ;;  %v790_v54 = vmul.f32 %v764_v48, %v764_v48  ;;  %v791_v58 = vmul.f32 %v765_v52, %v765_v52 }
 0x120   :  { %v792_v63 = vmul.f32 %v766_v53, %v766_v53  ;;  %v793_v3 = vmul.f32 %v767_v56, %v767_v56  ;;  %v770_v5 = vsub.f32 %v1525_v12, %v1541_v45  ;;  %v794_v7 = vmul.f32 %v768_v62, %v768_v62  ;;  %v833_v53 = vld [vmem:[%s1613_s3] sm:$0x1] }
 0x121   :  { %v801_v55 = vadd.f32 %v789_v50, %v788_v49  ;;  %v771_v10 = vsub.f32 %v1528_v17, %v1541_v45  ;;  %v795_v11 = vmul.f32 %v769_v1, %v769_v1  ;;  %v772_v14 = vsub.f32 %v1531_v21, %v1541_v45  ;;  %v831_v49 = vld [vmem:[%s1612_s2] sm:$0x1] }
 0x122   :  { %v774_v15 = vsub.f32 %v1537_v32, %v1541_v45  ;;  %v796_v16 = vmul.f32 %v770_v5, %v770_v5  ;;  %v773_v19 = vsub.f32 %v1534_v25, %v1541_v45 }
 0x123   :  { %v802_v60 = vadd.f32 %v801_v55, %v790_v54  ;;  %v797_v20 = vmul.f32 %v771_v10, %v771_v10  ;;  %v798_v24 = vmul.f32 %v772_v14, %v772_v14 }
 0x124   :  { %v787_v23 = vmul.f32 %v1135_v30, %v774_v15  ;;  %v799_v27 = vmul.f32 %v773_v19, %v773_v19 }
 0x125   :  { %v803_v0 = vadd.f32 %v802_v60, %v791_v58 }
 0x126   :  { %v800_v29 = vmul.f32 %v787_v23, %v787_v23 }
 0x127   :  { %v804_v4 = vadd.f32 %v803_v0, %v792_v63 }
 0x129   :  { %v805_v8 = vadd.f32 %v804_v4, %v793_v3 }
 0x12b   :  { %v806_v13 = vadd.f32 %v805_v8, %v794_v7 }
 0x12d   :  { %v807_v18 = vadd.f32 %v806_v13, %v795_v11 }
 0x12f   :  { %v808_v22 = vadd.f32 %v807_v18, %v796_v16 }
 0x131   :  { %v809_v26 = vadd.f32 %v808_v22, %v797_v20 }
 0x133   :  { %v810_v28 = vadd.f32 %v809_v26, %v798_v24 }
 0x135   :  { %v811_v31 = vadd.f32 %v810_v28, %v799_v27 }
 0x137   :  { %v812_v33 = vadd.f32 %v811_v31, %v800_v29 }
 0x139   :  { %v813_v34 = vrot.slane %v812_v33, 4 }
 0x13b   :  { %v814_v35 = vadd.f32 %v813_v34, %v812_v33 }
 0x13d   :  { %v815_v36 = vrot.slane %v814_v35, 2 }
 0x13f   :  { %v816_v37 = vadd.f32 %v815_v36, %v814_v35 }
 0x141   :  { %v817_v38 = vrot.slane %v816_v37, 1 }
 0x143   :  { %v818_v39 = vadd.f32 %v817_v38, %v816_v37 }
 0x145   :  { %v819_v40 = vmul.f32 0.010204081, %v818_v39 }
 0x147   :  { %v820_v41 = vadd.f32 1e-05, %v819_v40 }
 0x149   :  { %1228 = vrsqrt.f32 %v820_v41  ;;  %vm827_vm2 = vweird.f32 %v820_v41 }
 0x14f   :  { %v1229_v42 = vpop.eup %1228 }
 0x150   :  { %v822_v43 = vmul.f32 %v1229_v42, %v820_v41  ;;  %vm828_vm1 = vweird.f32 %v1229_v42 }
 0x151   :  { %vm829_vm3 = vmor %vm827_vm2, %vm828_vm1 }
 0x152   :  { %v823_v46 = vmul.f32 %v1229_v42, %v822_v43 }
 0x154   :  { %v824_v30 = vmul.f32 0.5, %v823_v46 }
 0x156   :  { %v825_v47 = vsub.f32 1.5, %v824_v30 }
 0x158   :  { %v826_v48 = vmul.f32 %v1229_v42, %v825_v47 }
 0x15a   :  { %v830_v50 = vsel %vm829_vm3, %v1229_v42, %v826_v48 }
 0x15b   :  { %v832_v52 = vmul.f32 %v831_v49, %v830_v50 }
 0x15d   :  { %v834_v54 = vmul.f32 %v832_v52, %v1541_v45  ;;  %v837_v55 = vperm.slane %v832_v52, 0 }
 0x15f   :  { %v835_v56 = vsub.f32 %v833_v53, %v834_v54  ;;  %v839_v58 = vmul.f32 %v837_v55, %v1502_v59  ;;  %v840_v60 = vmul.f32 %v837_v55, %v1504_v2  ;;  %v841_v62 = vmul.f32 %v837_v55, %v1506_v9 }
 0x160   :  { %v842_v63 = vmul.f32 %v837_v55, %v1510_v44  ;;  %v843_v0 = vmul.f32 %v837_v55, %v1513_v51  ;;  %v844_v1 = vmul.f32 %v837_v55, %v1516_v57  ;;  %v845_v3 = vmul.f32 %v837_v55, %v1519_v61 }
 0x161   :  { %v846_v4 = vmul.f32 %v837_v55, %v1522_v6  ;;  %v847_v45 = vmul.f32 %v837_v55, %v1525_v12  ;;  %v853_v5 = vperm.slane %v835_v56, 0  ;;  %v848_v7 = vmul.f32 %v837_v55, %v1528_v17 }
 0x162   :  { %v849_v59 = vmul.f32 %v837_v55, %v1531_v21  ;;  %v850_v2 = vmul.f32 %v837_v55, %v1534_v25  ;;  %v851_v9 = vmul.f32 %v837_v55, %v1537_v32 }
 0x163   :  { %v855_v44 = vadd.f32 %v853_v5, %v839_v58  ;;  %v856_v8 = vadd.f32 %v853_v5, %v840_v60  ;;  %v857_v51 = vadd.f32 %v853_v5, %v841_v62  ;;  %v858_v10 = vadd.f32 %v853_v5, %v842_v63 }
 0x164   :  { %v859_v57 = vadd.f32 %v853_v5, %v843_v0  ;;  %v860_v11 = vadd.f32 %v853_v5, %v844_v1  ;;  %v861_v61 = vadd.f32 %v853_v5, %v845_v3  ;;  %v862_v13 = vadd.f32 %v853_v5, %v846_v4 }
 0x165   :  { %v863_v6 = vadd.f32 %v853_v5, %v847_v45  ;;  %v864_v14 = vadd.f32 %v853_v5, %v848_v7  ;;  %v865_v12 = vadd.f32 %v853_v5, %v849_v59  ;;  %v866_v15 = vadd.f32 %v853_v5, %v850_v2 }
 0x166   :  { %v867_v16 = vadd.f32 %v853_v5, %v851_v9  ;;  %v868_v17 = vmax.f32 %v855_v44, 0.0  ;;  %v869_v18 = vmax.f32 %v856_v8, 0.0  ;;  %v870_v21 = vmax.f32 %v857_v51, 0.0 }
 0x167   :  { %v871_v19 = vmax.f32 %v858_v10, 0.0  ;;  %v872_v25 = vmax.f32 %v859_v57, 0.0  ;;  %v873_v20 = vmax.f32 %v860_v11, 0.0  ;;  %v874_v32 = vmax.f32 %v861_v61, 0.0 }
 0x168   :  { %v875_v22 = vmax.f32 %v862_v13, 0.0  ;;  %v876_v23 = vmax.f32 %v863_v6, 0.0  ;;  %v877_v24 = vmax.f32 %v864_v14, 0.0  ;;  %v878_v26 = vmax.f32 %v865_v12, 0.0 }
 0x169   :  { %v879_v27 = vmax.f32 %v866_v15, 0.0  ;;  %v880_v28 = vmax.f32 %v867_v16, 0.0  ;;  %v1195_v29 = vpack.c.bf16 %v869_v18, %v868_v17  ;;  %v1200_v31 = vpack.c.bf16 %v871_v19, %v870_v21 }
 0x16a   :  { %v1205_v33 = vpack.c.bf16 %v873_v20, %v872_v25  ;;  %v1210_v34 = vpack.c.bf16 %v875_v22, %v874_v32  ;;  %v1215_v35 = vpack.c.bf16 %v877_v24, %v876_v23 }
 0x16b   :  { %1196 = vst [vmem:[%s1614_s4] sm:$0xff] %v1195_v29   ;;  %v1220_v36 = vpack.c.bf16 %v879_v27, %v878_v26  ;;  %v893_v37 = vpack.c.bf16 %v880_v28, %v880_v28 }
 0x16c   :  { %1222 = vst [vmem:[%s1614_s4 + $0x8] sm:$0xff] %v1200_v31  }
 0x16d   :  { %1223 = vst [vmem:[%s1614_s4 + $0x10] sm:$0xff] %v1205_v33  }
 0x16e   :  { %1224 = vst [vmem:[%s1614_s4 + $0x18] sm:$0xff] %v1210_v34  }
 0x16f   :  { %1225 = vst [vmem:[%s1614_s4 + $0x20] sm:$0xff] %v1215_v35  }
 0x170   :  { %1226 = vst [vmem:[%s1614_s4 + $0x28] sm:$0xff] %v1220_v36  }
 0x171   :  { %906 = vst [vmem:[%s1614_s4 + $0x30] sm:$0xf] %v893_v37 }

// kernel: dqn_forward.6
= control target key start
LH: loop header
LB: loop body
LE: loop exit
PB: predicated region body
PF: predicated region fallthrough
CT: control target
= control target key end

     0   :  { %s479_s15 = smov 0   ;;  %s512_s0 = inlined_call_operand.vmem [shape: bf16[8,896], index: 0, kind: input, shape index: {}]   ;;  %s513_s1 = inlined_call_operand.vmem [shape: bf16[896,128], index: 1, kind: input, shape index: {}]   ;;  %s514_s2 = inlined_call_operand.vmem [shape: f32[1,128], index: 2, kind: input, shape index: {}]   ;;  %s515_s3 = inlined_call_operand.vmem [shape: f32[1,128], index: 3, kind: input, shape index: {}]   ;;  %s516_s4 = inlined_call_operand.vmem [shape: bf16[8,128], index: 4, kind: output, shape index: {}]  }
   0x1 LB: > { %s485_s16 = sadd.s32 4294967295, %s451_s15   ;;  %p386_p0 = scmp.ge.s32.totalorder %s451_s15, 1  ;;  %s451_s15 = sphi %s479_s15, %s14_s15  }
   0x2   : > { %p167_p1 = scmp.lt.s32.totalorder %s451_s15, 8 }
   0x4   : > { %p168_p2 = pnand %p386_p0, %p167_p1 }
   0x5   : > { %p192_p3 = scmp.lt.s32.totalorder (!%p168_p2), %s485_s16, 6  ;;  %s388_s17 = sshll.u32 (!%p168_p2), %s485_s16, 4 }
   0x6   : > { %171 = sbr.rel (%p168_p2) target bundleno = 254 (0xfe), region = 36  ;;  %p197_p4 = scmp.lt.s32.totalorder (!%p168_p2), %s388_s17, 111 }
   0x7   : > { %p390_p5 = scmp.ne.s32.totalorder (!%p168_p2), %s485_s16, 0 }
   0xb   : > { %s193_s18 = scalar_select %p192_p3, %s485_s16, 6 }
   0xc   : > { %s518_s17 = smov (!%p197_p4, %s388_s17), 111  ;;  %205 = sbr.rel (%p390_p5) target bundleno = 19 (0x13), region = 40 }
   0xd   : > { %s387_s19 = sshll.u32 %s193_s18, 2  ;;  %s389_s23 = sshll.u32 %s518_s17, 2 }
   0xe   : > { %s195_s22 = scalar_lea.vmem %s512_s0, %s387_s19  ;;  %s200_s26 = scalar_lea.vmem %s513_s1, %s389_s23 }
  0x11   : > { %v453_v0 = vmov 0.0  }
  0x12   : > { %206 = vst [vmem:[#allocation2] sm:$0xff] %v453_v0 }
  0x13 PF: > { %v433_v1 = vld [vmem:[%s200_s26 + $0x38] sm:$0xff]  ;;  %v432_v2 = vld [vmem:[%s200_s26 + $0x30] sm:$0xff]  ;;  %v431_v3 = vld [vmem:[%s200_s26 + $0x28] sm:$0xff]  ;;  %p423_p6 = scmp.ne.s32.totalorder %s485_s16, 6 }
  0x14   : > { %273 = vmatpush.bf16.msra.mxu0 %v433_v1  ;;  %v430_v4 = vld [vmem:[%s200_s26 + $0x20] sm:$0xff]  ;;  %v429_v5 = vld [vmem:[%s200_s26 + $0x18] sm:$0xff]  ;;  %v428_v6 = vld [vmem:[%s200_s26 + $0x10] sm:$0xff] }
  0x15   : > { %v427_v7 = vld [vmem:[%s200_s26 + $0x8] sm:$0xff]  ;;  %v426_v8 = vld [vmem:[%s200_s26] sm:$0xff] }
  0x16   : > { %v208_v9 = vld [vmem:[%s195_s22] sm:$0xf] }
  0x18   : > { %274 = vmatpush.bf16.msra.mxu0 %v432_v2 }
  0x19   : > { %v207_v10 = vld [vmem:[#allocation2] sm:$0xff] }
  0x1c   : > { %275 = vmatpush.bf16.msra.mxu0 %v431_v3 }
  0x20   : > { %276 = vmatpush.bf16.msra.mxu0 %v430_v4 }
  0x24   : > { %277 = vmatpush.bf16.msra.mxu0 %v429_v5 }
  0x28   : > { %278 = vmatpush.bf16.msra.mxu0 %v428_v6 }
  0x2c   : > { %279 = vmatpush.bf16.msra.mxu0 %v427_v7 }
  0x30   : > { %280 = vmatpush.bf16.msra.mxu0 %v426_v8 }
  0x33   : > { %281 = vmatmul.bf16.vlgmr.msra.gmra.mxu0 %v208_v9 }
  0xb0   : > { %v282_v11 = vpop.f32.mrf.mxu0 }
  0xb1   : > { %v286_v12 = vadd.f32 %v282_v11, %v207_v10 }
  0xb3   : > { %287 = vst [vmem:[#allocation2] sm:$0xff] %v286_v12 }
  0xb4   : > { %291 = sbr.rel (%p423_p6) target bundleno = 254 (0xfe), region = 44 }
  0xb8   : > { %v284_v13 = vpop.f32.mrf.mxu0 }
  0xb9   : > { %v327_v38 = vld [vmem:[%s514_s2] sm:$0x1] }
  0xba   : > { %v292_v14 = vld [vmem:[#allocation2] sm:$0xff] }
  0xbb   : > { %v299_v15 = vrot.slane %v292_v14, 4  ;;  %v329_v41 = vld [vmem:[%s515_s3] sm:$0x1] }
  0xbd   : > { %v300_v16 = vadd.f32 %v299_v15, %v292_v14 }
  0xbf   : > { %v301_v17 = vrot.slane %v300_v16, 2 }
  0xc1   : > { %v302_v18 = vadd.f32 %v301_v17, %v300_v16 }
  0xc3   : > { %v303_v19 = vrot.slane %v302_v18, 1 }
  0xc5   : > { %v304_v20 = vadd.f32 %v303_v19, %v302_v18 }
  0xc7   : > { %v305_v21 = vmul.f32 0.125, %v304_v20 }
  0xc9   : > { %v306_v22 = vsub.f32 %v292_v14, %v305_v21 }
  0xcb   : > { %v308_v23 = vmul.f32 %v306_v22, %v306_v22 }
  0xcd   : > { %v309_v24 = vrot.slane %v308_v23, 4 }
  0xcf   : > { %v310_v25 = vadd.f32 %v309_v24, %v308_v23 }
  0xd1   : > { %v311_v26 = vrot.slane %v310_v25, 2 }
  0xd3   : > { %v312_v27 = vadd.f32 %v311_v26, %v310_v25 }
  0xd5   : > { %v313_v28 = vrot.slane %v312_v27, 1 }
  0xd7   : > { %v314_v29 = vadd.f32 %v313_v28, %v312_v27 }
  0xd9   : > { %v315_v30 = vmul.f32 0.125, %v314_v29 }
  0xdb   : > { %v316_v31 = vadd.f32 1e-05, %v315_v30 }
  0xdd   : > { %443 = vrsqrt.f32 %v316_v31  ;;  %vm323_vm0 = vweird.f32 %v316_v31 }
  0xe3   : > { %v444_v32 = vpop.eup %443 }
  0xe4   : > { %v318_v33 = vmul.f32 %v444_v32, %v316_v31  ;;  %vm324_vm1 = vweird.f32 %v444_v32 }
  0xe5   : > { %vm325_vm2 = vmor %vm323_vm0, %vm324_vm1 }
  0xe6   : > { %v319_v34 = vmul.f32 %v444_v32, %v318_v33 }
  0xe8   : > { %v320_v35 = vmul.f32 0.5, %v319_v34 }
  0xea   : > { %v321_v36 = vsub.f32 1.5, %v320_v35 }
  0xec   : > { %v322_v37 = vmul.f32 %v444_v32, %v321_v36 }
  0xee   : > { %v326_v39 = vsel %vm325_vm2, %v444_v32, %v322_v37 }
  0xef   : > { %v328_v40 = vmul.f32 %v327_v38, %v326_v39 }
  0xf1   : > { %v330_v42 = vmul.f32 %v328_v40, %v305_v21  ;;  %v333_v43 = vperm.slane %v328_v40, 0 }
  0xf3   : > { %v331_v44 = vsub.f32 %v329_v41, %v330_v42  ;;  %v335_v45 = vmul.f32 %v333_v43, %v292_v14 }
  0xf5   : > { %v337_v46 = vperm.slane %v331_v44, 0 }
  0xf7   : > { %v339_v47 = vadd.f32 %v337_v46, %v335_v45 }
  0xf9   : > { %v340_v48 = vmax.f32 %v339_v47, 0.0 }
  0xfb   : > { %v341_v49 = vpack.c.bf16 %v340_v48, %v340_v48 }
  0xfd   : > { %342 = vst [vmem:[%s516_s4] sm:$0xf] %v341_v49 }
  0xfe PF: > { %s14_s15 = sadd.s32 1, %s451_s15  }
  0xff   : > { %p11_p7 = scmp.ge.s32.totalorder %s14_s15, 9  }
 0x101   :  { %13 = sbr.rel (!%p11_p7) target bundleno = 1 (0x1), region = 73 }

// kernel: dqn_forward.7
= control target key start
LH: loop header
LB: loop body
LE: loop exit
PB: predicated region body
PF: predicated region fallthrough
CT: control target
= control target key end

     0   :  { %s195_s1 = inlined_call_operand.vmem [shape: bf16[128,128], index: 1, kind: input, shape index: {}]   ;;  %s196_s2 = inlined_call_operand.vmem [shape: f32[1,128], index: 2, kind: input, shape index: {}]   ;;  %s197_s0 = inlined_call_operand.vmem [shape: bf16[8,128], index: 0, kind: input, shape index: {}]   ;;  %s198_s3 = inlined_call_operand.vmem [shape: f32[8,128], index: 3, kind: output, shape index: {}]  }
   0x1   :  { %v140_v0 = vld [vmem:[%s195_s1 + $0x38] sm:$0xff]  ;;  %v139_v1 = vld [vmem:[%s195_s1 + $0x30] sm:$0xff]  ;;  %v138_v2 = vld [vmem:[%s195_s1 + $0x28] sm:$0xff] }
   0x2   :  { %83 = vmatpush.bf16.msra.mxu0 %v140_v0  ;;  %v137_v3 = vld [vmem:[%s195_s1 + $0x20] sm:$0xff]  ;;  %v136_v4 = vld [vmem:[%s195_s1 + $0x18] sm:$0xff]  ;;  %v135_v5 = vld [vmem:[%s195_s1 + $0x10] sm:$0xff] }
   0x3   :  { %v134_v6 = vld [vmem:[%s195_s1 + $0x8] sm:$0xff]  ;;  %v133_v7 = vld [vmem:[%s195_s1] sm:$0xff] }
   0x4   :  { %v14_v8 = vld [vmem:[%s197_s0] sm:$0xf] }
   0x5   :  { %v141_v9 = vld [vmem:[%s196_s2] ss:$0 sm:$0xff] }
   0x6   :  { %84 = vmatpush.bf16.msra.mxu0 %v139_v1 }
   0xa   :  { %85 = vmatpush.bf16.msra.mxu0 %v138_v2 }
   0xe   :  { %86 = vmatpush.bf16.msra.mxu0 %v137_v3 }
  0x12   :  { %87 = vmatpush.bf16.msra.mxu0 %v136_v4 }
  0x16   :  { %88 = vmatpush.bf16.msra.mxu0 %v135_v5 }
  0x1a   :  { %89 = vmatpush.bf16.msra.mxu0 %v134_v6 }
  0x1e   :  { %90 = vmatpush.bf16.msra.mxu0 %v133_v7 }
  0x21   :  { %91 = vmatmul.bf16.vlgmr.msra.gmra.mxu0 %v14_v8 }
  0x9e   :  { %v92_v10 = vpop.f32.mrf.mxu0 }
  0x9f   :  { %v93_v11 = vadd.f32 %v141_v9, %v92_v10 }
  0xa1   :  { %96 = vst [vmem:[%s198_s3] sm:$0xff] %v93_v11 }
  0xa6   :  { %v94_v12 = vpop.f32.mrf.mxu0 }

</bundles_post_ra>
